<compile_context>
chip_gen: v7x
topology: tpu7x:2x2x1
jax: 0.10.0
libtpu: 0.0.40
codegen_flags: <defaults>
</compile_context>

<pallas_src>
import math

import numpy as np
import jax
import jax.numpy as jnp
from jax import lax
from jax.experimental import pallas as pl
from jax.experimental.pallas import tpu as pltpu

# ----------------------------------------------------------------------------
# Small-but-consistent configuration of CartTensorOut.__init__
# ----------------------------------------------------------------------------
NODE_DIM = 32             # node_dim
GATE_HIDDEN = 16          # hidden_dim of gate_mlp
MU = 8                    # multiplicity of every hidden irrep
ORDER = 2                 # order -> rank-2 cartesian tensor
OUTPUT_DIM = 9            # 3**order  -> trace_out == False
LANE = 256                # node tile width (lanes) -- raised per perf review
NUM_CORES = 2             # leading "parallel" grid axis (both TCs on v7x; harmless elsewhere)
SPH_ROWS_PAD = 16         # padded row count for the 9 spherical/cartesian feature rows
G_LANE = 128              # lane padding of the pooled (per-graph) output

# edge_irreps = '16x0e + 8x1o + 4x2e'   ; irrep = (l, parity)
IRREPS_IN = [(16, (0, 1)), (8, (1, -1)), (4, (2, 1))]
# hidden_irreps = '8x0e + 8x1o + 8x2e'
IRREPS_HIDDEN = [(MU, (l, p)) for _, (l, p) in IRREPS_IN]
# ReducedTensorProducts('ij', i='1o', j='1o').irreps_out = 1x0e + 1x1e + 1x2e
IRREPS_RTP_OUT = [(1, (0, 1)), (1, (1, 1)), (1, (2, 1))]


def irreps_offsets(irreps):
    offs, o = [], 0
    for mul, (l, _) in irreps:
        offs.append(o)
        o += mul * (2 * l + 1)
    return offs, o


# ----------------------------------------------------------------------------
# Real-basis Wigner-3j / Clebsch-Gordan coefficients (structural constants)
# ----------------------------------------------------------------------------
def _su2_cg(j1, m1, j2, m2, j3, m3):
    if m3 != m1 + m2:
        return 0.0
    vmin = int(max(-j1 + j2 + m3, -j1 + m1, 0))
    vmax = int(min(j2 + j3 + m1, j3 - j1 + j2, j3 + m3))

    def f(n):
        return float(math.factorial(int(round(n))))

    C = ((2.0 * j3 + 1.0) * f(j3 + j1 - j2) * f(j3 - j1 + j2) * f(j1 + j2 - j3)
         * f(j3 + m3) * f(j3 - m3)
         / (f(j1 + j2 + j3 + 1) * f(j1 - m1) * f(j1 + m1) * f(j2 - m2) * f(j2 + m2))) ** 0.5
    S = 0.0
    for v in range(vmin, vmax + 1):
        S += ((-1.0) ** (v + j2 + m2)) * f(j2 + j3 + m1 - v) * f(j1 - m1 + v) / (
            f(v) * f(j3 - j1 + j2 - v) * f(j3 + m3 - v) * f(v + j1 - j2 - m3))
    return C * S


def _su2_cg_tensor(l1, l2, l3):
    C = np.zeros((2 * l1 + 1, 2 * l2 + 1, 2 * l3 + 1))
    for i, m1 in enumerate(range(-l1, l1 + 1)):
        for j, m2 in enumerate(range(-l2, l2 + 1)):
            for k, m3 in enumerate(range(-l3, l3 + 1)):
                C[i, j, k] = _su2_cg(l1, m1, l2, m2, l3, m3)
    return C


def _real_to_complex(l):
    q = np.zeros((2 * l + 1, 2 * l + 1), dtype=np.complex128)
    for m in range(-l, 0):
        q[l + m, l + abs(m)] = 1.0 / np.sqrt(2)
        q[l + m, l - abs(m)] = -1j / np.sqrt(2)
    q[l, l] = 1.0
    for m in range(1, l + 1):
        q[l + m, l + abs(m)] = ((-1) ** m) / np.sqrt(2)
        q[l + m, l - abs(m)] = 1j * ((-1) ** m) / np.sqrt(2)
    return ((-1j) ** l) * q


def real_wigner_3j(l1, l2, l3):
    # TODO(synk): sign conventions may differ from e3nn's exact wigner_3j; structurally equivalent
    # (Frobenius norm 1, same sparsity / equivariance).
    Q1, Q2, Q3 = _real_to_complex(l1), _real_to_complex(l2), _real_to_complex(l3)
    C = _su2_cg_tensor(l1, l2, l3).astype(np.complex128)
    C = np.einsum("ij,kl,mn,ikn->jlm", Q1, Q2, np.conj(Q3.T), C)
    re, im = np.real(C), np.imag(C)
    C = re if np.linalg.norm(re) >= np.linalg.norm(im) else im
    n = np.linalg.norm(C)
    return (C / n) if n > 0 else C


# ----------------------------------------------------------------------------
# get_feasible_tp equivalent (instruction / output-irreps bookkeeping)
# ----------------------------------------------------------------------------
def feasible_tp(irreps1, irreps2, irreps_filter, mode):
    filt = {}
    for mul, ir in irreps_filter:
        filt[ir] = filt.get(ir, 0) + mul
    out_list, instructions = [], []
    for i, (_, (l1, p1)) in enumerate(irreps1):
        for j, (_, (l2, p2)) in enumerate(irreps2):
            for l3 in range(abs(l1 - l2), l1 + l2 + 1):
                ir3 = (l3, p1 * p2)
                if ir3 not in filt:
                    continue
                entry = (filt[ir3], ir3)
                if entry in out_list:
                    k = out_list.index(entry)
                else:
                    k = len(out_list)
                    out_list.append(entry)
                instructions.append((i, j, k, mode, True))
    # TODO(synk): irreps sort order ("e" before "o") may differ from e3nn's canonical sort.
    order = sorted(range(len(out_list)), key=lambda k: (out_list[k][1][0], -out_list[k][1][1]))
    perm = {old: new for new, old in enumerate(order)}
    out_sorted = [out_list[o] for o in order]
    instructions = [(i, j, perm[k], m, tr) for (i, j, k, m, tr) in instructions]
    return out_sorted, instructions


IRREPS_TPOUT, INSTR_OUT = feasible_tp(IRREPS_HIDDEN, IRREPS_HIDDEN, IRREPS_RTP_OUT, "uuw")
# post_trans == False in this configuration (irreps_tp_out == rtp.irreps_out)
assert IRREPS_TPOUT == IRREPS_RTP_OUT

HID_OFF, HID_DIM = irreps_offsets(IRREPS_HIDDEN)
OUT_OFF, OUT_DIM = irreps_offsets(IRREPS_TPOUT)
IN_OFF, IN_DIM = irreps_offsets(IRREPS_IN)
WEIGHT_NUMEL = len(INSTR_OUT) * MU          # 'uuw' weights: (mul_u=MU, mul_w=1) per instruction

FRONT_IN = IN_DIM + NODE_DIM + 1            # [x_spherical | x_scalar | ones (b1 fold)]
FRONT_IN_PAD = 128                          # lane-aligned padded feature width of x_cat
FRONT_OUT = HID_DIM + GATE_HIDDEN           # [hidden spherical feats | gate pre-activation]

_out_counts = {}
for (_, _, _k, _, _) in INSTR_OUT:
    _out_counts[_k] = _out_counts.get(_k, 0) + 1

# PATHS: per TP instruction: (i, j, k, weight_row_offset, alpha, cg_tensor).
# alpha = sqrt((2l3+1) / (count_k * MU)) matches e3nn's default normalization for 'uuw'.
PATHS = []
for _t, (_i, _j, _k, _, _) in enumerate(INSTR_OUT):
    _l1 = IRREPS_HIDDEN[_i][1][0]
    _l2 = IRREPS_HIDDEN[_j][1][0]
    _l3 = IRREPS_TPOUT[_k][1][0]
    _cg = real_wigner_3j(_l1, _l2, _l3)
    _alpha = math.sqrt((2 * _l3 + 1) / (_out_counts[_k] * MU))
    PATHS.append((_i, _j, _k, _t * MU, _alpha, _cg))

# Kernel term plan: one "term" per (path, m1, m2) pair with any nonzero CG entry.  The constant
# CG matrix (alpha * c folded in, replicated across the MU channel columns) turns the whole
# CG contraction + channel sum into a single MXU matmul.
TERM_PLAN = []        # per path: (i, j, weight_row_offset, [(m1, m2), ...])
_cg_entries = []      # (output_row, term_index, alpha * c)
N_TERMS = 0
for (_i, _j, _k, _woff, _alpha, _cg) in PATHS:
    _d1, _d2, _d3 = _cg.shape
    _pairs = []
    for _m1 in range(_d1):
        for _m2 in range(_d2):
            _nz = [(_m3, float(_cg[_m1, _m2, _m3])) for _m3 in range(_d3)
                   if abs(_cg[_m1, _m2, _m3]) > 1e-9]
            if not _nz:
                continue
            _pairs.append((_m1, _m2))
            for (_m3, _c) in _nz:
                _cg_entries.append((OUT_OFF[_k] + _m3, N_TERMS, _alpha * _c))
            N_TERMS += 1
    TERM_PLAN.append((_i, _j, _woff, _pairs))

CG_MAT_NP = np.zeros((SPH_ROWS_PAD, N_TERMS * MU), np.float32)
for (_r, _t, _coef) in _cg_entries:
    CG_MAT_NP[_r, _t * MU:(_t + 1) * MU] = _coef


def build_change_of_basis():
    # ReducedTensorProducts('ij', i='1o', j='1o').change_of_basis, shape (9, 3, 3)
    Q = np.zeros((OUTPUT_DIM, 3, 3), dtype=np.float32)
    off = 0
    for l in (0, 1, 2):
        w = real_wigner_3j(1, 1, l)           # (3, 3, 2l+1)
        for m in range(2 * l + 1):
            Q[off + m] = math.sqrt(2 * l + 1) * w[:, :, m]
        off += 2 * l + 1
    return Q


def feat_major_perm(irreps):
    # feature-major index [irrep][m][u]  ->  e3nn index [irrep][u][m]
    offs, dim = irreps_offsets(irreps)
    perm = np.zeros(dim, dtype=np.int64)
    for a, (mul, (l, _)) in enumerate(irreps):
        d = 2 * l + 1
        for m in range(d):
            for u in range(mul):
                perm[offs[a] + m * mul + u] = offs[a] + u * d + m
    return perm


# ----------------------------------------------------------------------------
# The single fused Pallas kernel
# ----------------------------------------------------------------------------
def _fused_kernel(x_ref, batch_ref, wfront_ref, w2t_ref, b2_ref, cg_ref, qt_ref,
                  out_ref, hid_scr, w_scr, prod_scr):
    t = pl.program_id(1)

    @pl.when(t == 0)
    def _init():
        out_ref[...] = jnp.zeros_like(out_ref)      # per-core resident pooled accumulator

    # ---- fused front-end: o3.Linear projection + gate-MLP layer 1 (+ b1 via ones column) as
    #      ONE MXU matmul; node-major input block is contracted over its feature (lane) axis
    #      (rhs-transposed dot_general, same pattern as q @ k^T) -> feature-major result.
    front = lax.dot_general(wfront_ref[...], x_ref[...],
                            (((1,), (1,)), ((), ())),
                            preferred_element_type=jnp.float32)         # (FRONT_OUT, LANE)
    hid_scr[...] = front[:HID_DIM, :]                                   # hidden feats, feat-major
    h = front[HID_DIM:FRONT_OUT, :]
    h = h * jax.nn.sigmoid(h)                                           # SiLU (EUP)
    w_scr[...] = jnp.dot(w2t_ref[...], h,
                         preferred_element_type=jnp.float32) + b2_ref[...]   # per-node TP weights

    # ---- TensorProduct 'uuw': build the (N_TERMS*MU, LANE) pairwise-product operand with
    #      aligned 8-row stores; path normalisation, CG coefficients and the channel(u) sum all
    #      live in the constant CG matrix, so all 9 output rows come from one MXU matmul.
    term = 0
    for (i, j, woff, pairs) in TERM_PLAN:
        w_path = w_scr[woff:woff + MU, :]
        wa = {}
        for (m1, m2) in pairs:
            if m1 not in wa:                       # reuse w*x(m1) across all m2 of this path
                wa[m1] = w_path * hid_scr[HID_OFF[i] + m1 * MU:HID_OFF[i] + (m1 + 1) * MU, :]
            prod_scr[term * MU:(term + 1) * MU, :] = (
                wa[m1] * hid_scr[HID_OFF[j] + m2 * MU:HID_OFF[j] + (m2 + 1) * MU, :])
            term += 1

    sph_blk = jnp.dot(cg_ref[...], prod_scr[...],
                      preferred_element_type=jnp.float32)                # (16, LANE) lane-dense

    # ---- scatter(..., reduce='sum') over graphs: in-kernel one-hot (no O(N*G) HBM operand),
    #      contracted over the node lanes straight into the resident pooled block.
    g_pad = out_ref.shape[1]
    graph_iota = lax.broadcasted_iota(jnp.int32, (g_pad, LANE), 0)
    onehot_t = (graph_iota == batch_ref[...]).astype(jnp.float32)        # (g_pad, LANE)
    out_ref[...] += lax.dot_general(sph_blk, onehot_t,
                                    (((1,), (1,)), ((), ())),
                                    preferred_element_type=jnp.float32)

    # ---- change of basis (cartesian_index permutation pre-folded into Q) on the last step of
    #      this core's node tiles.  Q is linear, so applying it to each core's partial sum and
    #      combining in the wrapper is exact (no cross-core race).
    @pl.when(t == pl.num_programs(1) - 1)
    def _finalize():
        out_ref[...] = jnp.dot(qt_ref[...], out_ref[...],
                               preferred_element_type=jnp.float32)


def cart_tensor_out_forward(params, batch, x_scalar, x_spherical, num_graphs):
    n = x_spherical.shape[0]
    super_tile = LANE * NUM_CORES
    n_pad = pl.cdiv(n, super_tile) * super_tile
    tiles_per_core = n_pad // super_tile
    g_pad = pl.cdiv(max(int(num_graphs), 1), G_LANE) * G_LANE

    # Node-major inputs, no wrapper-side transpose; the ones column folds b1 into W_front.
    # TODO(synk): on v6e/v7x x_cat / W_front could stream as bf16 (f32 accumulation); kept f32 so
    # the identical kernel is exact on v5e (no bf16 VPU/EUP).
    x_cat = jnp.concatenate(
        [x_spherical.astype(jnp.float32), x_scalar.astype(jnp.float32),
         jnp.ones((n, 1), jnp.float32)], axis=1)
    x_cat = jnp.pad(x_cat, ((0, n_pad - n), (0, FRONT_IN_PAD - FRONT_IN)))   # (n_pad, 128)
    batch_ids = jnp.pad(batch.astype(jnp.int32), (0, n_pad - n),
                        constant_values=-1).reshape(1, n_pad)                # -1 never pools

    partials = pl.pallas_call(
        _fused_kernel,
        out_shape=jax.ShapeDtypeStruct((NUM_CORES, SPH_ROWS_PAD, g_pad), jnp.float32),
        grid=(NUM_CORES, tiles_per_core),
        in_specs=[
            pl.BlockSpec((LANE, FRONT_IN_PAD), lambda c, t: (c * tiles_per_core + t, 0)),
            pl.BlockSpec((1, LANE), lambda c, t: (0, c * tiles_per_core + t)),
            pl.BlockSpec((FRONT_OUT, FRONT_IN_PAD), lambda c, t: (0, 0)),
            pl.BlockSpec((WEIGHT_NUMEL, GATE_HIDDEN), lambda c, t: (0, 0)),
            pl.BlockSpec((WEIGHT_NUMEL, 1), lambda c, t: (0, 0)),
            pl.BlockSpec((SPH_ROWS_PAD, N_TERMS * MU), lambda c, t: (0, 0)),
            pl.BlockSpec((SPH_ROWS_PAD, SPH_ROWS_PAD), lambda c, t: (0, 0)),
        ],
        out_specs=pl.BlockSpec((None, SPH_ROWS_PAD, g_pad), lambda c, t: (c, 0, 0)),
        scratch_shapes=[
            pltpu.VMEM((HID_DIM, LANE), jnp.float32),        # hidden feats (feature-major)
            pltpu.VMEM((WEIGHT_NUMEL, LANE), jnp.float32),   # per-node TP weights
            pltpu.VMEM((N_TERMS * MU, LANE), jnp.float32),   # pairwise-product operand
        ],
        compiler_params=pltpu.CompilerParams(
            dimension_semantics=("parallel", "arbitrary")),
    )(x_cat, batch_ids, params["W_front"], params["W2T"], params["b2c"],
      params["CG_MAT"], params["QTpad"])

    pooled = jnp.sum(partials, axis=0)          # tiny cross-core combine (Q already applied)
    return pooled[:OUT_DIM, :num_graphs].T.reshape(num_graphs, 3, 3)


# ----------------------------------------------------------------------------
# Parameter init (deterministic, synthetic) + kernel-layout precomputation
# ----------------------------------------------------------------------------
def init_o3_linear(key, irreps_in, irreps_out):
    offs_in, din = irreps_offsets(irreps_in)
    offs_out, dout = irreps_offsets(irreps_out)
    W = np.zeros((din, dout), dtype=np.float32)
    subkeys = jax.random.split(key, len(irreps_in) * len(irreps_out))
    for a, (mi, ir_i) in enumerate(irreps_in):
        for b, (mo, ir_o) in enumerate(irreps_out):
            if ir_i != ir_o:
                continue
            sub = subkeys[a * len(irreps_out) + b]
            l = ir_i[0]
            d = 2 * l + 1
            blk = np.asarray(jax.random.normal(sub, (mi, mo), jnp.float32)) / math.sqrt(mi)
            for m in range(d):
                rows = offs_in[a] + np.arange(mi) * d + m
                cols = offs_out[b] + np.arange(mo) * d + m
                W[np.ix_(rows, cols)] = blk
    return jnp.asarray(W)


def init_params(key):
    kpre, k1, k2, kb1, kb2 = jax.random.split(key, 5)
    W_pre = init_o3_linear(kpre, IRREPS_IN, IRREPS_HIDDEN)                     # (IN_DIM, HID_DIM)
    W1 = jax.random.normal(k1, (NODE_DIM, GATE_HIDDEN), jnp.float32) / math.sqrt(NODE_DIM)
    b1 = 0.1 * jax.random.normal(kb1, (GATE_HIDDEN,), jnp.float32)
    W2 = jax.random.normal(k2, (GATE_HIDDEN, WEIGHT_NUMEL), jnp.float32) / math.sqrt(GATE_HIDDEN)
    b2 = 0.1 * jax.random.normal(kb2, (WEIGHT_NUMEL,), jnp.float32)

    # feature-major ([m major, u minor] rows) projection weight, transposed for the kernel
    perm = feat_major_perm(IRREPS_HIDDEN)
    Wpre_fm = np.asarray(W_pre).T[perm, :].astype(np.float32)                  # (HID_DIM, IN_DIM)

    # fused front-end weight:  [ Wpre_fm |   0   | 0  ]      rows 0..HID_DIM-1
    #                          [    0    | W1^T  | b1 ]      rows HID_DIM..FRONT_OUT-1
    W_front = np.zeros((FRONT_OUT, FRONT_IN_PAD), np.float32)
    W_front[:HID_DIM, :IN_DIM] = Wpre_fm
    W_front[HID_DIM:, IN_DIM:IN_DIM + NODE_DIM] = np.asarray(W1).T
    W_front[HID_DIM:, IN_DIM + NODE_DIM] = np.asarray(b1)

    # change of basis with the cartesian_index ([2,0,1] on both dims) permutation folded in
    Qflat = build_change_of_basis().reshape(OUTPUT_DIM, 9)                     # (9, 9)
    idx = [2, 0, 1]
    colperm = np.array([3 * idx[i] + idx[j] for i in range(3) for j in range(3)])
    Qperm = Qflat[:, colperm].astype(np.float32)
    QTpad = np.zeros((SPH_ROWS_PAD, SPH_ROWS_PAD), np.float32)
    QTpad[:OUT_DIM, :OUT_DIM] = Qperm.T

    return {
        # raw (e3nn node-major) parameters, used by the pure-JAX reference check
        "W_pre": W_pre, "W1": W1, "b1": b1, "W2": W2, "b2": b2,
        "Qperm": jnp.asarray(Qperm),
        # kernel-layout parameters
        "W_front": jnp.asarray(W_front),
        "W2T": jnp.asarray(np.asarray(W2).T),
        "b2c": b2.reshape(WEIGHT_NUMEL, 1),
        "CG_MAT": jnp.asarray(CG_MAT_NP),
        "QTpad": jnp.asarray(QTpad),
    }


# ----------------------------------------------------------------------------
# Pure-JAX reference (same structural constants) for a numerical sanity check
# ----------------------------------------------------------------------------
def reference_forward(params, batch, x_scalar, x_spherical, num_graphs):
    n = x_spherical.shape[0]
    x_sph = x_spherical @ params["W_pre"]
    h = x_scalar @ params["W1"] + params["b1"]
    h = h * jax.nn.sigmoid(h)
    tpw = h @ params["W2"] + params["b2"]
    out = jnp.zeros((n, OUT_DIM), jnp.float32)
    for (i, j, k, woff, alpha, cg) in PATHS:
        d1, d2, d3 = cg.shape
        x1 = x_sph[:, HID_OFF[i]:HID_OFF[i] + MU * d1].reshape(n, MU, d1)
        x2 = x_sph[:, HID_OFF[j]:HID_OFF[j] + MU * d2].reshape(n, MU, d2)
        w = tpw[:, woff:woff + MU]
        contrib = alpha * jnp.einsum("nu,nua,nub,abc->nc", w, x1, x2,
                                     jnp.asarray(cg.astype(np.float32)))
        out = out.at[:, OUT_OFF[k]:OUT_OFF[k] + d3].add(contrib)
    pooled = jax.ops.segment_sum(out, batch, num_segments=num_graphs)
    res = pooled @ params["Qperm"]
    return res.reshape(num_graphs, 3, 3)


if __name__ == "__main__":
    key = jax.random.PRNGKey(0)
    k_in1, k_in2, k_par = jax.random.split(key, 3)

    # > LANE*NUM_CORES so both the parallel core axis and the per-core multi-tile
    # accumulation path are exercised.
    n_atoms = 600
    n_graphs = 3
    batch = jnp.concatenate([jnp.full((180,), 0, jnp.int32),
                             jnp.full((230,), 1, jnp.int32),
                             jnp.full((190,), 2, jnp.int32)])
    x_scalar = jax.random.normal(k_in1, (n_atoms, NODE_DIM), jnp.float32)
    x_spherical = jax.random.normal(k_in2, (n_atoms, IN_DIM), jnp.float32)

    params = init_params(k_par)

    fwd = jax.jit(cart_tensor_out_forward, static_argnums=(4,))
    out = jax.block_until_ready(fwd(params, batch, x_scalar, x_spherical, n_graphs))
    ref = jax.block_until_ready(reference_forward(params, batch, x_scalar, x_spherical, n_graphs))

    assert out.shape == (n_graphs, 3, 3)
    assert bool(jnp.all(jnp.isfinite(out)))
    rel = float(jnp.linalg.norm(out - ref) / (jnp.linalg.norm(ref) + 1e-6))
    assert rel < 1e-4, f"kernel/reference relative error too large: {rel}"
    print("KERNEL_OK")
</pallas_src>

<mosaic_0001>
module attributes {stable_mosaic.version = 11 : i64} {
  func.func @_fused_kernel(%arg0: i32, %arg1: i32, %arg2: memref<256x128xf32, #tpu.memory_space<vmem>>, %arg3: memref<1x256xi32, #tpu.memory_space<vmem>>, %arg4: memref<88x128xf32, #tpu.memory_space<vmem>>, %arg5: memref<72x16xf32, #tpu.memory_space<vmem>>, %arg6: memref<72x1xf32, #tpu.memory_space<vmem>>, %arg7: memref<16x584xf32, #tpu.memory_space<vmem>>, %arg8: memref<16x16xf32, #tpu.memory_space<vmem>>, %arg9: memref<1x16x128xf32, #tpu.memory_space<vmem>>, %arg10: memref<72x256xf32, #tpu.memory_space<vmem>>, %arg11: memref<72x256xf32, #tpu.memory_space<vmem>>, %arg12: memref<584x256xf32, #tpu.memory_space<vmem>>) attributes {dimension_semantics = [#tpu.dimension_semantics<parallel>, #tpu.dimension_semantics<arbitrary>], iteration_bounds = array<i64: 2, 2>, scalar_prefetch = 0 : i64, scratch_operands = 3 : i64, tpu.core_type = #tpu.core_type<tc>, window_params = [{transform_indices = @transform_0, window_bounds = array<i64: 256, 128>}, {transform_indices = @transform_1, window_bounds = array<i64: 1, 256>}, {pipeline_mode = #tpu.pipeline_mode<synchronous>, transform_indices = @transform_2, window_bounds = array<i64: 88, 128>}, {pipeline_mode = #tpu.pipeline_mode<synchronous>, transform_indices = @transform_3, window_bounds = array<i64: 72, 16>}, {pipeline_mode = #tpu.pipeline_mode<synchronous>, transform_indices = @transform_4, window_bounds = array<i64: 72, 1>}, {pipeline_mode = #tpu.pipeline_mode<synchronous>, transform_indices = @transform_5, window_bounds = array<i64: 16, 584>}, {pipeline_mode = #tpu.pipeline_mode<synchronous>, transform_indices = @transform_6, window_bounds = array<i64: 16, 16>}, {transform_indices = @transform_7, window_bounds = array<i64: 1, 16, 128>}]} {
    %c0_i32 = arith.constant 0 : i32
    %0 = arith.cmpi eq, %arg1, %c0_i32 : i32
    %1 = arith.extui %0 : i1 to i32
    %c0_i32_0 = arith.constant 0 : i32
    %2 = arith.cmpi ne, %1, %c0_i32_0 : i32
    scf.if %2 {
      %cst_329 = arith.constant 0.000000e+00 : f32
      %330 = vector.broadcast %cst_329 : f32 to vector<16x128xf32>
      %c0_330 = arith.constant 0 : index
      %c0_331 = arith.constant 0 : index
      %c0_332 = arith.constant 0 : index
      %331 = vector.load %arg9[%c0_330, %c0_331, %c0_332] : memref<1x16x128xf32, #tpu.memory_space<vmem>>, vector<1x16x128xf32>
      %332 = vector.shape_cast %331 : vector<1x16x128xf32> to vector<16x128xf32>
      %333 = vector.shape_cast %330 : vector<16x128xf32> to vector<1x16x128xf32>
      tpu.vector_store %arg9[%c0_330, %c0_331, %c0_332], %333 {strides = array<i32>} : memref<1x16x128xf32, #tpu.memory_space<vmem>>, vector<1x16x128xf32>,
    } else {
    }
    %c0 = arith.constant 0 : index
    %c0_1 = arith.constant 0 : index
    %3 = vector.load %arg4[%c0, %c0_1] : memref<88x128xf32, #tpu.memory_space<vmem>>, vector<88x128xf32>
    %c0_2 = arith.constant 0 : index
    %c0_3 = arith.constant 0 : index
    %4 = vector.load %arg2[%c0_2, %c0_3] : memref<256x128xf32, #tpu.memory_space<vmem>>, vector<256x128xf32>
    %cst = arith.constant dense<0.000000e+00> : vector<88x256xf32>
    %5 = tpu.matmul %3, %4, %cst {dimension_numbers = #tpu.dot_dimension_numbers<[1], [1], [0], [0], [0, 0, 1, 0], [], []>} : vector<88x128xf32>, vector<256x128xf32>, vector<88x256xf32> -> vector<88x256xf32>
    %6 = vector.extract_strided_slice %5 {offsets = [0, 0], sizes = [72, 256], strides = [1, 1]} : vector<88x256xf32> to vector<72x256xf32>
    %c0_4 = arith.constant 0 : index
    %c0_5 = arith.constant 0 : index
    %7 = vector.load %arg10[%c0_4, %c0_5] : memref<72x256xf32, #tpu.memory_space<vmem>>, vector<72x256xf32>
    tpu.vector_store %arg10[%c0_4, %c0_5], %6 {strides = array<i32>} : memref<72x256xf32, #tpu.memory_space<vmem>>, vector<72x256xf32>,
    %8 = vector.extract_strided_slice %5 {offsets = [72, 0], sizes = [16, 256], strides = [1, 1]} : vector<88x256xf32> to vector<16x256xf32>
    %9 = arith.negf %8 : vector<16x256xf32>
    %10 = math.exp %9 : vector<16x256xf32>
    %cst_6 = arith.constant 1.000000e+00 : f32
    %11 = vector.broadcast %cst_6 : f32 to vector<16x256xf32>
    %12 = arith.addf %11, %10 : vector<16x256xf32>
    %13 = arith.divf %11, %12 : vector<16x256xf32>
    %14 = arith.mulf %8, %13 : vector<16x256xf32>
    %c0_7 = arith.constant 0 : index
    %c0_8 = arith.constant 0 : index
    %15 = vector.load %arg5[%c0_7, %c0_8] : memref<72x16xf32, #tpu.memory_space<vmem>>, vector<72x16xf32>
    %cst_9 = arith.constant dense<0.000000e+00> : vector<72x256xf32>
    %16 = tpu.matmul %15, %14, %cst_9 {dimension_numbers = #tpu.dot_dimension_numbers<[1], [0], [0], [1], [0, 0, 1, 1], [], []>} : vector<72x16xf32>, vector<16x256xf32>, vector<72x256xf32> -> vector<72x256xf32>
    %c0_10 = arith.constant 0 : index
    %c0_11 = arith.constant 0 : index
    %17 = vector.load %arg6[%c0_10, %c0_11] : memref<72x1xf32, #tpu.memory_space<vmem>>, vector<72x1xf32>
    %18 = vector.broadcast %17 : vector<72x1xf32> to vector<72x256xf32>
    %19 = arith.addf %16, %18 : vector<72x256xf32>
    %c0_12 = arith.constant 0 : index
    %c0_13 = arith.constant 0 : index
    %20 = vector.load %arg11[%c0_12, %c0_13] : memref<72x256xf32, #tpu.memory_space<vmem>>, vector<72x256xf32>
    tpu.vector_store %arg11[%c0_12, %c0_13], %19 {strides = array<i32>} : memref<72x256xf32, #tpu.memory_space<vmem>>, vector<72x256xf32>,
    %c0_14 = arith.constant 0 : index
    %c0_15 = arith.constant 0 : index
    %21 = vector.load %arg11[%c0_14, %c0_15] : memref<72x256xf32, #tpu.memory_space<vmem>>, vector<8x256xf32>
    %c0_16 = arith.constant 0 : index
    %c0_17 = arith.constant 0 : index
    %22 = vector.load %arg10[%c0_16, %c0_17] : memref<72x256xf32, #tpu.memory_space<vmem>>, vector<8x256xf32>
    %23 = arith.mulf %21, %22 : vector<8x256xf32>
    %c0_18 = arith.constant 0 : index
    %c0_19 = arith.constant 0 : index
    %24 = vector.load %arg10[%c0_18, %c0_19] : memref<72x256xf32, #tpu.memory_space<vmem>>, vector<8x256xf32>
    %25 = arith.mulf %23, %24 : vector<8x256xf32>
    %c0_20 = arith.constant 0 : index
    %c0_21 = arith.constant 0 : index
    %26 = vector.load %arg12[%c0_20, %c0_21] : memref<584x256xf32, #tpu.memory_space<vmem>>, vector<8x256xf32>
    tpu.vector_store %arg12[%c0_20, %c0_21], %25 {strides = array<i32>} : memref<584x256xf32, #tpu.memory_space<vmem>>, vector<8x256xf32>,
    %c8 = arith.constant 8 : index
    %c0_22 = arith.constant 0 : index
    %27 = vector.load %arg11[%c8, %c0_22] : memref<72x256xf32, #tpu.memory_space<vmem>>, vector<8x256xf32>
    %c0_23 = arith.constant 0 : index
    %c0_24 = arith.constant 0 : index
    %28 = vector.load %arg10[%c0_23, %c0_24] : memref<72x256xf32, #tpu.memory_space<vmem>>, vector<8x256xf32>
    %29 = arith.mulf %27, %28 : vector<8x256xf32>
    %c32 = arith.constant 32 : index
    %c0_25 = arith.constant 0 : index
    %30 = vector.load %arg10[%c32, %c0_25] : memref<72x256xf32, #tpu.memory_space<vmem>>, vector<8x256xf32>
    %31 = arith.mulf %29, %30 : vector<8x256xf32>
    %c8_26 = arith.constant 8 : index
    %c0_27 = arith.constant 0 : index
    %32 = vector.load %arg12[%c8_26, %c0_27] : memref<584x256xf32, #tpu.memory_space<vmem>>, vector<8x256xf32>
    tpu.vector_store %arg12[%c8_26, %c0_27], %31 {strides = array<i32>} : memref<584x256xf32, #tpu.memory_space<vmem>>, vector<8x256xf32>,
    %c40 = arith.constant 40 : index
    %c0_28 = arith.constant 0 : index
    %33 = vector.load %arg10[%c40, %c0_28] : memref<72x256xf32, #tpu.memory_space<vmem>>, vector<8x256xf32>
    %34 = arith.mulf %29, %33 : vector<8x256xf32>
    %c16 = arith.constant 16 : index
    %c0_29 = arith.constant 0 : index
    %35 = vector.load %arg12[%c16, %c0_29] : memref<584x256xf32, #tpu.memory_space<vmem>>, vector<8x256xf32>
    tpu.vector_store %arg12[%c16, %c0_29], %34 {strides = array<i32>} : memref<584x256xf32, #tpu.memory_space<vmem>>, vector<8x256xf32>,
    %c48 = arith.constant 48 : index
    %c0_30 = arith.constant 0 : index
    %36 = vector.load %arg10[%c48, %c0_30] : memref<72x256xf32, #tpu.memory_space<vmem>>, vector<8x256xf32>
    %37 = arith.mulf %29, %36 : vector<8x256xf32>
    %c24 = arith.constant 24 : index
    %c0_31 = arith.constant 0 : index
    %38 = vector.load %arg12[%c24, %c0_31] : memref<584x256xf32, #tpu.memory_space<vmem>>, vector<8x256xf32>
    tpu.vector_store %arg12[%c24, %c0_31], %37 {strides = array<i32>} : memref<584x256xf32, #tpu.memory_space<vmem>>, vector<8x256xf32>,
    %c56 = arith.constant 56 : index
    %c0_32 = arith.constant 0 : index
    %39 = vector.load %arg10[%c56, %c0_32] : memref<72x256xf32, #tpu.memory_space<vmem>>, vector<8x256xf32>
    %40 = arith.mulf %29, %39 : vector<8x256xf32>
    %c32_33 = arith.constant 32 : index
    %c0_34 = arith.constant 0 : index
    %41 = vector.load %arg12[%c32_33, %c0_34] : memref<584x256xf32, #tpu.memory_space<vmem>>, vector<8x256xf32>
    tpu.vector_store %arg12[%c32_33, %c0_34], %40 {strides = array<i32>} : memref<584x256xf32, #tpu.memory_space<vmem>>, vector<8x256xf32>,
    %c64 = arith.constant 64 : index
    %c0_35 = arith.constant 0 : index
    %42 = vector.load %arg10[%c64, %c0_35] : memref<72x256xf32, #tpu.memory_space<vmem>>, vector<8x256xf32>
    %43 = arith.mulf %29, %42 : vector<8x256xf32>
    %c40_36 = arith.constant 40 : index
    %c0_37 = arith.constant 0 : index
    %44 = vector.load %arg12[%c40_36, %c0_37] : memref<584x256xf32, #tpu.memory_space<vmem>>, vector<8x256xf32>
    tpu.vector_store %arg12[%c40_36, %c0_37], %43 {strides = array<i32>} : memref<584x256xf32, #tpu.memory_space<vmem>>, vector<8x256xf32>,
    %c16_38 = arith.constant 16 : index
    %c0_39 = arith.constant 0 : index
    %45 = vector.load %arg11[%c16_38, %c0_39] : memref<72x256xf32, #tpu.memory_space<vmem>>, vector<8x256xf32>
    %c8_40 = arith.constant 8 : index
    %c0_41 = arith.constant 0 : index
    %46 = vector.load %arg10[%c8_40, %c0_41] : memref<72x256xf32, #tpu.memory_space<vmem>>, vector<8x256xf32>
    %47 = arith.mulf %45, %46 : vector<8x256xf32>
    %c8_42 = arith.constant 8 : index
    %c0_43 = arith.constant 0 : index
    %48 = vector.load %arg10[%c8_42, %c0_43] : memref<72x256xf32, #tpu.memory_space<vmem>>, vector<8x256xf32>
    %49 = arith.mulf %47, %48 : vector<8x256xf32>
    %c48_44 = arith.constant 48 : index
    %c0_45 = arith.constant 0 : index
    %50 = vector.load %arg12[%c48_44, %c0_45] : memref<584x256xf32, #tpu.memory_space<vmem>>, vector<8x256xf32>
    tpu.vector_store %arg12[%c48_44, %c0_45], %49 {strides = array<i32>} : memref<584x256xf32, #tpu.memory_space<vmem>>, vector<8x256xf32>,
    %c16_46 = arith.constant 16 : index
    %c0_47 = arith.constant 0 : index
    %51 = vector.load %arg10[%c16_46, %c0_47] : memref<72x256xf32, #tpu.memory_space<vmem>>, vector<8x256xf32>
    %52 = arith.mulf %45, %51 : vector<8x256xf32>
    %c16_48 = arith.constant 16 : index
    %c0_49 = arith.constant 0 : index
    %53 = vector.load %arg10[%c16_48, %c0_49] : memref<72x256xf32, #tpu.memory_space<vmem>>, vector<8x256xf32>
    %54 = arith.mulf %52, %53 : vector<8x256xf32>
    %c56_50 = arith.constant 56 : index
    %c0_51 = arith.constant 0 : index
    %55 = vector.load %arg12[%c56_50, %c0_51] : memref<584x256xf32, #tpu.memory_space<vmem>>, vector<8x256xf32>
    tpu.vector_store %arg12[%c56_50, %c0_51], %54 {strides = array<i32>} : memref<584x256xf32, #tpu.memory_space<vmem>>, vector<8x256xf32>,
    %c24_52 = arith.constant 24 : index
    %c0_53 = arith.constant 0 : index
    %56 = vector.load %arg10[%c24_52, %c0_53] : memref<72x256xf32, #tpu.memory_space<vmem>>, vector<8x256xf32>
    %57 = arith.mulf %45, %56 : vector<8x256xf32>
    %c24_54 = arith.constant 24 : index
    %c0_55 = arith.constant 0 : index
    %58 = vector.load %arg10[%c24_54, %c0_55] : memref<72x256xf32, #tpu.memory_space<vmem>>, vector<8x256xf32>
    %59 = arith.mulf %57, %58 : vector<8x256xf32>
    %c64_56 = arith.constant 64 : index
    %c0_57 = arith.constant 0 : index
    %60 = vector.load %arg12[%c64_56, %c0_57] : memref<584x256xf32, #tpu.memory_space<vmem>>, vector<8x256xf32>
    tpu.vector_store %arg12[%c64_56, %c0_57], %59 {strides = array<i32>} : memref<584x256xf32, #tpu.memory_space<vmem>>, vector<8x256xf32>,
    %c24_58 = arith.constant 24 : index
    %c0_59 = arith.constant 0 : index
    %61 = vector.load %arg11[%c24_58, %c0_59] : memref<72x256xf32, #tpu.memory_space<vmem>>, vector<8x256xf32>
    %c8_60 = arith.constant 8 : index
    %c0_61 = arith.constant 0 : index
    %62 = vector.load %arg10[%c8_60, %c0_61] : memref<72x256xf32, #tpu.memory_space<vmem>>, vector<8x256xf32>
    %63 = arith.mulf %61, %62 : vector<8x256xf32>
    %c16_62 = arith.constant 16 : index
    %c0_63 = arith.constant 0 : index
    %64 = vector.load %arg10[%c16_62, %c0_63] : memref<72x256xf32, #tpu.memory_space<vmem>>, vector<8x256xf32>
    %65 = arith.mulf %63, %64 : vector<8x256xf32>
    %c72 = arith.constant 72 : index
    %c0_64 = arith.constant 0 : index
    %66 = vector.load %arg12[%c72, %c0_64] : memref<584x256xf32, #tpu.memory_space<vmem>>, vector<8x256xf32>
    tpu.vector_store %arg12[%c72, %c0_64], %65 {strides = array<i32>} : memref<584x256xf32, #tpu.memory_space<vmem>>, vector<8x256xf32>,
    %c24_65 = arith.constant 24 : index
    %c0_66 = arith.constant 0 : index
    %67 = vector.load %arg10[%c24_65, %c0_66] : memref<72x256xf32, #tpu.memory_space<vmem>>, vector<8x256xf32>
    %68 = arith.mulf %63, %67 : vector<8x256xf32>
    %c80 = arith.constant 80 : index
    %c0_67 = arith.constant 0 : index
    %69 = vector.load %arg12[%c80, %c0_67] : memref<584x256xf32, #tpu.memory_space<vmem>>, vector<8x256xf32>
    tpu.vector_store %arg12[%c80, %c0_67], %68 {strides = array<i32>} : memref<584x256xf32, #tpu.memory_space<vmem>>, vector<8x256xf32>,
    %c16_68 = arith.constant 16 : index
    %c0_69 = arith.constant 0 : index
    %70 = vector.load %arg10[%c16_68, %c0_69] : memref<72x256xf32, #tpu.memory_space<vmem>>, vector<8x256xf32>
    %71 = arith.mulf %61, %70 : vector<8x256xf32>
    %c8_70 = arith.constant 8 : index
    %c0_71 = arith.constant 0 : index
    %72 = vector.load %arg10[%c8_70, %c0_71] : memref<72x256xf32, #tpu.memory_space<vmem>>, vector<8x256xf32>
    %73 = arith.mulf %71, %72 : vector<8x256xf32>
    %c88 = arith.constant 88 : index
    %c0_72 = arith.constant 0 : index
    %74 = vector.load %arg12[%c88, %c0_72] : memref<584x256xf32, #tpu.memory_space<vmem>>, vector<8x256xf32>
    tpu.vector_store %arg12[%c88, %c0_72], %73 {strides = array<i32>} : memref<584x256xf32, #tpu.memory_space<vmem>>, vector<8x256xf32>,
    %c24_73 = arith.constant 24 : index
    %c0_74 = arith.constant 0 : index
    %75 = vector.load %arg10[%c24_73, %c0_74] : memref<72x256xf32, #tpu.memory_space<vmem>>, vector<8x256xf32>
    %76 = arith.mulf %71, %75 : vector<8x256xf32>
    %c96 = arith.constant 96 : index
    %c0_75 = arith.constant 0 : index
    %77 = vector.load %arg12[%c96, %c0_75] : memref<584x256xf32, #tpu.memory_space<vmem>>, vector<8x256xf32>
    tpu.vector_store %arg12[%c96, %c0_75], %76 {strides = array<i32>} : memref<584x256xf32, #tpu.memory_space<vmem>>, vector<8x256xf32>,
    %c24_76 = arith.constant 24 : index
    %c0_77 = arith.constant 0 : index
    %78 = vector.load %arg10[%c24_76, %c0_77] : memref<72x256xf32, #tpu.memory_space<vmem>>, vector<8x256xf32>
    %79 = arith.mulf %61, %78 : vector<8x256xf32>
    %c8_78 = arith.constant 8 : index
    %c0_79 = arith.constant 0 : index
    %80 = vector.load %arg10[%c8_78, %c0_79] : memref<72x256xf32, #tpu.memory_space<vmem>>, vector<8x256xf32>
    %81 = arith.mulf %79, %80 : vector<8x256xf32>
    %c104 = arith.constant 104 : index
    %c0_80 = arith.constant 0 : index
    %82 = vector.load %arg12[%c104, %c0_80] : memref<584x256xf32, #tpu.memory_space<vmem>>, vector<8x256xf32>
    tpu.vector_store %arg12[%c104, %c0_80], %81 {strides = array<i32>} : memref<584x256xf32, #tpu.memory_space<vmem>>, vector<8x256xf32>,
    %c16_81 = arith.constant 16 : index
    %c0_82 = arith.constant 0 : index
    %83 = vector.load %arg10[%c16_81, %c0_82] : memref<72x256xf32, #tpu.memory_space<vmem>>, vector<8x256xf32>
    %84 = arith.mulf %79, %83 : vector<8x256xf32>
    %c112 = arith.constant 112 : index
    %c0_83 = arith.constant 0 : index
    %85 = vector.load %arg12[%c112, %c0_83] : memref<584x256xf32, #tpu.memory_space<vmem>>, vector<8x256xf32>
    tpu.vector_store %arg12[%c112, %c0_83], %84 {strides = array<i32>} : memref<584x256xf32, #tpu.memory_space<vmem>>, vector<8x256xf32>,
    %c32_84 = arith.constant 32 : index
    %c0_85 = arith.constant 0 : index
    %86 = vector.load %arg11[%c32_84, %c0_85] : memref<72x256xf32, #tpu.memory_space<vmem>>, vector<8x256xf32>
    %c8_86 = arith.constant 8 : index
    %c0_87 = arith.constant 0 : index
    %87 = vector.load %arg10[%c8_86, %c0_87] : memref<72x256xf32, #tpu.memory_space<vmem>>, vector<8x256xf32>
    %88 = arith.mulf %86, %87 : vector<8x256xf32>
    %c8_88 = arith.constant 8 : index
    %c0_89 = arith.constant 0 : index
    %89 = vector.load %arg10[%c8_88, %c0_89] : memref<72x256xf32, #tpu.memory_space<vmem>>, vector<8x256xf32>
    %90 = arith.mulf %88, %89 : vector<8x256xf32>
    %c120 = arith.constant 120 : index
    %c0_90 = arith.constant 0 : index
    %91 = vector.load %arg12[%c120, %c0_90] : memref<584x256xf32, #tpu.memory_space<vmem>>, vector<8x256xf32>
    tpu.vector_store %arg12[%c120, %c0_90], %90 {strides = array<i32>} : memref<584x256xf32, #tpu.memory_space<vmem>>, vector<8x256xf32>,
    %c16_91 = arith.constant 16 : index
    %c0_92 = arith.constant 0 : index
    %92 = vector.load %arg10[%c16_91, %c0_92] : memref<72x256xf32, #tpu.memory_space<vmem>>, vector<8x256xf32>
    %93 = arith.mulf %88, %92 : vector<8x256xf32>
    %c128 = arith.constant 128 : index
    %c0_93 = arith.constant 0 : index
    %94 = vector.load %arg12[%c128, %c0_93] : memref<584x256xf32, #tpu.memory_space<vmem>>, vector<8x256xf32>
    tpu.vector_store %arg12[%c128, %c0_93], %93 {strides = array<i32>} : memref<584x256xf32, #tpu.memory_space<vmem>>, vector<8x256xf32>,
    %c24_94 = arith.constant 24 : index
    %c0_95 = arith.constant 0 : index
    %95 = vector.load %arg10[%c24_94, %c0_95] : memref<72x256xf32, #tpu.memory_space<vmem>>, vector<8x256xf32>
    %96 = arith.mulf %88, %95 : vector<8x256xf32>
    %c136 = arith.constant 136 : index
    %c0_96 = arith.constant 0 : index
    %97 = vector.load %arg12[%c136, %c0_96] : memref<584x256xf32, #tpu.memory_space<vmem>>, vector<8x256xf32>
    tpu.vector_store %arg12[%c136, %c0_96], %96 {strides = array<i32>} : memref<584x256xf32, #tpu.memory_space<vmem>>, vector<8x256xf32>,
    %c16_97 = arith.constant 16 : index
    %c0_98 = arith.constant 0 : index
    %98 = vector.load %arg10[%c16_97, %c0_98] : memref<72x256xf32, #tpu.memory_space<vmem>>, vector<8x256xf32>
    %99 = arith.mulf %86, %98 : vector<8x256xf32>
    %c8_99 = arith.constant 8 : index
    %c0_100 = arith.constant 0 : index
    %100 = vector.load %arg10[%c8_99, %c0_100] : memref<72x256xf32, #tpu.memory_space<vmem>>, vector<8x256xf32>
    %101 = arith.mulf %99, %100 : vector<8x256xf32>
    %c144 = arith.constant 144 : index
    %c0_101 = arith.constant 0 : index
    %102 = vector.load %arg12[%c144, %c0_101] : memref<584x256xf32, #tpu.memory_space<vmem>>, vector<8x256xf32>
    tpu.vector_store %arg12[%c144, %c0_101], %101 {strides = array<i32>} : memref<584x256xf32, #tpu.memory_space<vmem>>, vector<8x256xf32>,
    %c16_102 = arith.constant 16 : index
    %c0_103 = arith.constant 0 : index
    %103 = vector.load %arg10[%c16_102, %c0_103] : memref<72x256xf32, #tpu.memory_space<vmem>>, vector<8x256xf32>
    %104 = arith.mulf %99, %103 : vector<8x256xf32>
    %c152 = arith.constant 152 : index
    %c0_104 = arith.constant 0 : index
    %105 = vector.load %arg12[%c152, %c0_104] : memref<584x256xf32, #tpu.memory_space<vmem>>, vector<8x256xf32>
    tpu.vector_store %arg12[%c152, %c0_104], %104 {strides = array<i32>} : memref<584x256xf32, #tpu.memory_space<vmem>>, vector<8x256xf32>,
    %c24_105 = arith.constant 24 : index
    %c0_106 = arith.constant 0 : index
    %106 = vector.load %arg10[%c24_105, %c0_106] : memref<72x256xf32, #tpu.memory_space<vmem>>, vector<8x256xf32>
    %107 = arith.mulf %99, %106 : vector<8x256xf32>
    %c160 = arith.constant 160 : index
    %c0_107 = arith.constant 0 : index
    %108 = vector.load %arg12[%c160, %c0_107] : memref<584x256xf32, #tpu.memory_space<vmem>>, vector<8x256xf32>
    tpu.vector_store %arg12[%c160, %c0_107], %107 {strides = array<i32>} : memref<584x256xf32, #tpu.memory_space<vmem>>, vector<8x256xf32>,
    %c24_108 = arith.constant 24 : index
    %c0_109 = arith.constant 0 : index
    %109 = vector.load %arg10[%c24_108, %c0_109] : memref<72x256xf32, #tpu.memory_space<vmem>>, vector<8x256xf32>
    %110 = arith.mulf %86, %109 : vector<8x256xf32>
    %c8_110 = arith.constant 8 : index
    %c0_111 = arith.constant 0 : index
    %111 = vector.load %arg10[%c8_110, %c0_111] : memref<72x256xf32, #tpu.memory_space<vmem>>, vector<8x256xf32>
    %112 = arith.mulf %110, %111 : vector<8x256xf32>
    %c168 = arith.constant 168 : index
    %c0_112 = arith.constant 0 : index
    %113 = vector.load %arg12[%c168, %c0_112] : memref<584x256xf32, #tpu.memory_space<vmem>>, vector<8x256xf32>
    tpu.vector_store %arg12[%c168, %c0_112], %112 {strides = array<i32>} : memref<584x256xf32, #tpu.memory_space<vmem>>, vector<8x256xf32>,
    %c16_113 = arith.constant 16 : index
    %c0_114 = arith.constant 0 : index
    %114 = vector.load %arg10[%c16_113, %c0_114] : memref<72x256xf32, #tpu.memory_space<vmem>>, vector<8x256xf32>
    %115 = arith.mulf %110, %114 : vector<8x256xf32>
    %c176 = arith.constant 176 : index
    %c0_115 = arith.constant 0 : index
    %116 = vector.load %arg12[%c176, %c0_115] : memref<584x256xf32, #tpu.memory_space<vmem>>, vector<8x256xf32>
    tpu.vector_store %arg12[%c176, %c0_115], %115 {strides = array<i32>} : memref<584x256xf32, #tpu.memory_space<vmem>>, vector<8x256xf32>,
    %c24_116 = arith.constant 24 : index
    %c0_117 = arith.constant 0 : index
    %117 = vector.load %arg10[%c24_116, %c0_117] : memref<72x256xf32, #tpu.memory_space<vmem>>, vector<8x256xf32>
    %118 = arith.mulf %110, %117 : vector<8x256xf32>
    %c184 = arith.constant 184 : index
    %c0_118 = arith.constant 0 : index
    %119 = vector.load %arg12[%c184, %c0_118] : memref<584x256xf32, #tpu.memory_space<vmem>>, vector<8x256xf32>
    tpu.vector_store %arg12[%c184, %c0_118], %118 {strides = array<i32>} : memref<584x256xf32, #tpu.memory_space<vmem>>, vector<8x256xf32>,
    %c40_119 = arith.constant 40 : index
    %c0_120 = arith.constant 0 : index
    %120 = vector.load %arg11[%c40_119, %c0_120] : memref<72x256xf32, #tpu.memory_space<vmem>>, vector<8x256xf32>
    %c32_121 = arith.constant 32 : index
    %c0_122 = arith.constant 0 : index
    %121 = vector.load %arg10[%c32_121, %c0_122] : memref<72x256xf32, #tpu.memory_space<vmem>>, vector<8x256xf32>
    %122 = arith.mulf %120, %121 : vector<8x256xf32>
    %c0_123 = arith.constant 0 : index
    %c0_124 = arith.constant 0 : index
    %123 = vector.load %arg10[%c0_123, %c0_124] : memref<72x256xf32, #tpu.memory_space<vmem>>, vector<8x256xf32>
    %124 = arith.mulf %122, %123 : vector<8x256xf32>
    %c192 = arith.constant 192 : index
    %c0_125 = arith.constant 0 : index
    %125 = vector.load %arg12[%c192, %c0_125] : memref<584x256xf32, #tpu.memory_space<vmem>>, vector<8x256xf32>
    tpu.vector_store %arg12[%c192, %c0_125], %124 {strides = array<i32>} : memref<584x256xf32, #tpu.memory_space<vmem>>, vector<8x256xf32>,
    %c40_126 = arith.constant 40 : index
    %c0_127 = arith.constant 0 : index
    %126 = vector.load %arg10[%c40_126, %c0_127] : memref<72x256xf32, #tpu.memory_space<vmem>>, vector<8x256xf32>
    %127 = arith.mulf %120, %126 : vector<8x256xf32>
    %c0_128 = arith.constant 0 : index
    %c0_129 = arith.constant 0 : index
    %128 = vector.load %arg10[%c0_128, %c0_129] : memref<72x256xf32, #tpu.memory_space<vmem>>, vector<8x256xf32>
    %129 = arith.mulf %127, %128 : vector<8x256xf32>
    %c200 = arith.constant 200 : index
    %c0_130 = arith.constant 0 : index
    %130 = vector.load %arg12[%c200, %c0_130] : memref<584x256xf32, #tpu.memory_space<vmem>>, vector<8x256xf32>
    tpu.vector_store %arg12[%c200, %c0_130], %129 {strides = array<i32>} : memref<584x256xf32, #tpu.memory_space<vmem>>, vector<8x256xf32>,
    %c48_131 = arith.constant 48 : index
    %c0_132 = arith.constant 0 : index
    %131 = vector.load %arg10[%c48_131, %c0_132] : memref<72x256xf32, #tpu.memory_space<vmem>>, vector<8x256xf32>
    %132 = arith.mulf %120, %131 : vector<8x256xf32>
    %c0_133 = arith.constant 0 : index
    %c0_134 = arith.constant 0 : index
    %133 = vector.load %arg10[%c0_133, %c0_134] : memref<72x256xf32, #tpu.memory_space<vmem>>, vector<8x256xf32>
    %134 = arith.mulf %132, %133 : vector<8x256xf32>
    %c208 = arith.constant 208 : index
    %c0_135 = arith.constant 0 : index
    %135 = vector.load %arg12[%c208, %c0_135] : memref<584x256xf32, #tpu.memory_space<vmem>>, vector<8x256xf32>
    tpu.vector_store %arg12[%c208, %c0_135], %134 {strides = array<i32>} : memref<584x256xf32, #tpu.memory_space<vmem>>, vector<8x256xf32>,
    %c56_136 = arith.constant 56 : index
    %c0_137 = arith.constant 0 : index
    %136 = vector.load %arg10[%c56_136, %c0_137] : memref<72x256xf32, #tpu.memory_space<vmem>>, vector<8x256xf32>
    %137 = arith.mulf %120, %136 : vector<8x256xf32>
    %c0_138 = arith.constant 0 : index
    %c0_139 = arith.constant 0 : index
    %138 = vector.load %arg10[%c0_138, %c0_139] : memref<72x256xf32, #tpu.memory_space<vmem>>, vector<8x256xf32>
    %139 = arith.mulf %137, %138 : vector<8x256xf32>
    %c216 = arith.constant 216 : index
    %c0_140 = arith.constant 0 : index
    %140 = vector.load %arg12[%c216, %c0_140] : memref<584x256xf32, #tpu.memory_space<vmem>>, vector<8x256xf32>
    tpu.vector_store %arg12[%c216, %c0_140], %139 {strides = array<i32>} : memref<584x256xf32, #tpu.memory_space<vmem>>, vector<8x256xf32>,
    %c64_141 = arith.constant 64 : index
    %c0_142 = arith.constant 0 : index
    %141 = vector.load %arg10[%c64_141, %c0_142] : memref<72x256xf32, #tpu.memory_space<vmem>>, vector<8x256xf32>
    %142 = arith.mulf %120, %141 : vector<8x256xf32>
    %c0_143 = arith.constant 0 : index
    %c0_144 = arith.constant 0 : index
    %143 = vector.load %arg10[%c0_143, %c0_144] : memref<72x256xf32, #tpu.memory_space<vmem>>, vector<8x256xf32>
    %144 = arith.mulf %142, %143 : vector<8x256xf32>
    %c224 = arith.constant 224 : index
    %c0_145 = arith.constant 0 : index
    %145 = vector.load %arg12[%c224, %c0_145] : memref<584x256xf32, #tpu.memory_space<vmem>>, vector<8x256xf32>
    tpu.vector_store %arg12[%c224, %c0_145], %144 {strides = array<i32>} : memref<584x256xf32, #tpu.memory_space<vmem>>, vector<8x256xf32>,
    %c48_146 = arith.constant 48 : index
    %c0_147 = arith.constant 0 : index
    %146 = vector.load %arg11[%c48_146, %c0_147] : memref<72x256xf32, #tpu.memory_space<vmem>>, vector<8x256xf32>
    %c32_148 = arith.constant 32 : index
    %c0_149 = arith.constant 0 : index
    %147 = vector.load %arg10[%c32_148, %c0_149] : memref<72x256xf32, #tpu.memory_space<vmem>>, vector<8x256xf32>
    %148 = arith.mulf %146, %147 : vector<8x256xf32>
    %c32_150 = arith.constant 32 : index
    %c0_151 = arith.constant 0 : index
    %149 = vector.load %arg10[%c32_150, %c0_151] : memref<72x256xf32, #tpu.memory_space<vmem>>, vector<8x256xf32>
    %150 = arith.mulf %148, %149 : vector<8x256xf32>
    %c232 = arith.constant 232 : index
    %c0_152 = arith.constant 0 : index
    %151 = vector.load %arg12[%c232, %c0_152] : memref<584x256xf32, #tpu.memory_space<vmem>>, vector<8x256xf32>
    tpu.vector_store %arg12[%c232, %c0_152], %150 {strides = array<i32>} : memref<584x256xf32, #tpu.memory_space<vmem>>, vector<8x256xf32>,
    %c40_153 = arith.constant 40 : index
    %c0_154 = arith.constant 0 : index
    %152 = vector.load %arg10[%c40_153, %c0_154] : memref<72x256xf32, #tpu.memory_space<vmem>>, vector<8x256xf32>
    %153 = arith.mulf %146, %152 : vector<8x256xf32>
    %c40_155 = arith.constant 40 : index
    %c0_156 = arith.constant 0 : index
    %154 = vector.load %arg10[%c40_155, %c0_156] : memref<72x256xf32, #tpu.memory_space<vmem>>, vector<8x256xf32>
    %155 = arith.mulf %153, %154 : vector<8x256xf32>
    %c240 = arith.constant 240 : index
    %c0_157 = arith.constant 0 : index
    %156 = vector.load %arg12[%c240, %c0_157] : memref<584x256xf32, #tpu.memory_space<vmem>>, vector<8x256xf32>
    tpu.vector_store %arg12[%c240, %c0_157], %155 {strides = array<i32>} : memref<584x256xf32, #tpu.memory_space<vmem>>, vector<8x256xf32>,
    %c48_158 = arith.constant 48 : index
    %c0_159 = arith.constant 0 : index
    %157 = vector.load %arg10[%c48_158, %c0_159] : memref<72x256xf32, #tpu.memory_space<vmem>>, vector<8x256xf32>
    %158 = arith.mulf %146, %157 : vector<8x256xf32>
    %c48_160 = arith.constant 48 : index
    %c0_161 = arith.constant 0 : index
    %159 = vector.load %arg10[%c48_160, %c0_161] : memref<72x256xf32, #tpu.memory_space<vmem>>, vector<8x256xf32>
    %160 = arith.mulf %158, %159 : vector<8x256xf32>
    %c248 = arith.constant 248 : index
    %c0_162 = arith.constant 0 : index
    %161 = vector.load %arg12[%c248, %c0_162] : memref<584x256xf32, #tpu.memory_space<vmem>>, vector<8x256xf32>
    tpu.vector_store %arg12[%c248, %c0_162], %160 {strides = array<i32>} : memref<584x256xf32, #tpu.memory_space<vmem>>, vector<8x256xf32>,
    %c56_163 = arith.constant 56 : index
    %c0_164 = arith.constant 0 : index
    %162 = vector.load %arg10[%c56_163, %c0_164] : memref<72x256xf32, #tpu.memory_space<vmem>>, vector<8x256xf32>
    %163 = arith.mulf %146, %162 : vector<8x256xf32>
    %c56_165 = arith.constant 56 : index
    %c0_166 = arith.constant 0 : index
    %164 = vector.load %arg10[%c56_165, %c0_166] : memref<72x256xf32, #tpu.memory_space<vmem>>, vector<8x256xf32>
    %165 = arith.mulf %163, %164 : vector<8x256xf32>
    %c256 = arith.constant 256 : index
    %c0_167 = arith.constant 0 : index
    %166 = vector.load %arg12[%c256, %c0_167] : memref<584x256xf32, #tpu.memory_space<vmem>>, vector<8x256xf32>
    tpu.vector_store %arg12[%c256, %c0_167], %165 {strides = array<i32>} : memref<584x256xf32, #tpu.memory_space<vmem>>, vector<8x256xf32>,
    %c64_168 = arith.constant 64 : index
    %c0_169 = arith.constant 0 : index
    %167 = vector.load %arg10[%c64_168, %c0_169] : memref<72x256xf32, #tpu.memory_space<vmem>>, vector<8x256xf32>
    %168 = arith.mulf %146, %167 : vector<8x256xf32>
    %c64_170 = arith.constant 64 : index
    %c0_171 = arith.constant 0 : index
    %169 = vector.load %arg10[%c64_170, %c0_171] : memref<72x256xf32, #tpu.memory_space<vmem>>, vector<8x256xf32>
    %170 = arith.mulf %168, %169 : vector<8x256xf32>
    %c264 = arith.constant 264 : index
    %c0_172 = arith.constant 0 : index
    %171 = vector.load %arg12[%c264, %c0_172] : memref<584x256xf32, #tpu.memory_space<vmem>>, vector<8x256xf32>
    tpu.vector_store %arg12[%c264, %c0_172], %170 {strides = array<i32>} : memref<584x256xf32, #tpu.memory_space<vmem>>, vector<8x256xf32>,
    %c56_173 = arith.constant 56 : index
    %c0_174 = arith.constant 0 : index
    %172 = vector.load %arg11[%c56_173, %c0_174] : memref<72x256xf32, #tpu.memory_space<vmem>>, vector<8x256xf32>
    %c32_175 = arith.constant 32 : index
    %c0_176 = arith.constant 0 : index
    %173 = vector.load %arg10[%c32_175, %c0_176] : memref<72x256xf32, #tpu.memory_space<vmem>>, vector<8x256xf32>
    %174 = arith.mulf %172, %173 : vector<8x256xf32>
    %c40_177 = arith.constant 40 : index
    %c0_178 = arith.constant 0 : index
    %175 = vector.load %arg10[%c40_177, %c0_178] : memref<72x256xf32, #tpu.memory_space<vmem>>, vector<8x256xf32>
    %176 = arith.mulf %174, %175 : vector<8x256xf32>
    %c272 = arith.constant 272 : index
    %c0_179 = arith.constant 0 : index
    %177 = vector.load %arg12[%c272, %c0_179] : memref<584x256xf32, #tpu.memory_space<vmem>>, vector<8x256xf32>
    tpu.vector_store %arg12[%c272, %c0_179], %176 {strides = array<i32>} : memref<584x256xf32, #tpu.memory_space<vmem>>, vector<8x256xf32>,
    %c56_180 = arith.constant 56 : index
    %c0_181 = arith.constant 0 : index
    %178 = vector.load %arg10[%c56_180, %c0_181] : memref<72x256xf32, #tpu.memory_space<vmem>>, vector<8x256xf32>
    %179 = arith.mulf %174, %178 : vector<8x256xf32>
    %c280 = arith.constant 280 : index
    %c0_182 = arith.constant 0 : index
    %180 = vector.load %arg12[%c280, %c0_182] : memref<584x256xf32, #tpu.memory_space<vmem>>, vector<8x256xf32>
    tpu.vector_store %arg12[%c280, %c0_182], %179 {strides = array<i32>} : memref<584x256xf32, #tpu.memory_space<vmem>>, vector<8x256xf32>,
    %c64_183 = arith.constant 64 : index
    %c0_184 = arith.constant 0 : index
    %181 = vector.load %arg10[%c64_183, %c0_184] : memref<72x256xf32, #tpu.memory_space<vmem>>, vector<8x256xf32>
    %182 = arith.mulf %174, %181 : vector<8x256xf32>
    %c288 = arith.constant 288 : index
    %c0_185 = arith.constant 0 : index
    %183 = vector.load %arg12[%c288, %c0_185] : memref<584x256xf32, #tpu.memory_space<vmem>>, vector<8x256xf32>
    tpu.vector_store %arg12[%c288, %c0_185], %182 {strides = array<i32>} : memref<584x256xf32, #tpu.memory_space<vmem>>, vector<8x256xf32>,
    %c40_186 = arith.constant 40 : index
    %c0_187 = arith.constant 0 : index
    %184 = vector.load %arg10[%c40_186, %c0_187] : memref<72x256xf32, #tpu.memory_space<vmem>>, vector<8x256xf32>
    %185 = arith.mulf %172, %184 : vector<8x256xf32>
    %c32_188 = arith.constant 32 : index
    %c0_189 = arith.constant 0 : index
    %186 = vector.load %arg10[%c32_188, %c0_189] : memref<72x256xf32, #tpu.memory_space<vmem>>, vector<8x256xf32>
    %187 = arith.mulf %185, %186 : vector<8x256xf32>
    %c296 = arith.constant 296 : index
    %c0_190 = arith.constant 0 : index
    %188 = vector.load %arg12[%c296, %c0_190] : memref<584x256xf32, #tpu.memory_space<vmem>>, vector<8x256xf32>
    tpu.vector_store %arg12[%c296, %c0_190], %187 {strides = array<i32>} : memref<584x256xf32, #tpu.memory_space<vmem>>, vector<8x256xf32>,
    %c48_191 = arith.constant 48 : index
    %c0_192 = arith.constant 0 : index
    %189 = vector.load %arg10[%c48_191, %c0_192] : memref<72x256xf32, #tpu.memory_space<vmem>>, vector<8x256xf32>
    %190 = arith.mulf %185, %189 : vector<8x256xf32>
    %c304 = arith.constant 304 : index
    %c0_193 = arith.constant 0 : index
    %191 = vector.load %arg12[%c304, %c0_193] : memref<584x256xf32, #tpu.memory_space<vmem>>, vector<8x256xf32>
    tpu.vector_store %arg12[%c304, %c0_193], %190 {strides = array<i32>} : memref<584x256xf32, #tpu.memory_space<vmem>>, vector<8x256xf32>,
    %c56_194 = arith.constant 56 : index
    %c0_195 = arith.constant 0 : index
    %192 = vector.load %arg10[%c56_194, %c0_195] : memref<72x256xf32, #tpu.memory_space<vmem>>, vector<8x256xf32>
    %193 = arith.mulf %185, %192 : vector<8x256xf32>
    %c312 = arith.constant 312 : index
    %c0_196 = arith.constant 0 : index
    %194 = vector.load %arg12[%c312, %c0_196] : memref<584x256xf32, #tpu.memory_space<vmem>>, vector<8x256xf32>
    tpu.vector_store %arg12[%c312, %c0_196], %193 {strides = array<i32>} : memref<584x256xf32, #tpu.memory_space<vmem>>, vector<8x256xf32>,
    %c64_197 = arith.constant 64 : index
    %c0_198 = arith.constant 0 : index
    %195 = vector.load %arg10[%c64_197, %c0_198] : memref<72x256xf32, #tpu.memory_space<vmem>>, vector<8x256xf32>
    %196 = arith.mulf %185, %195 : vector<8x256xf32>
    %c320 = arith.constant 320 : index
    %c0_199 = arith.constant 0 : index
    %197 = vector.load %arg12[%c320, %c0_199] : memref<584x256xf32, #tpu.memory_space<vmem>>, vector<8x256xf32>
    tpu.vector_store %arg12[%c320, %c0_199], %196 {strides = array<i32>} : memref<584x256xf32, #tpu.memory_space<vmem>>, vector<8x256xf32>,
    %c48_200 = arith.constant 48 : index
    %c0_201 = arith.constant 0 : index
    %198 = vector.load %arg10[%c48_200, %c0_201] : memref<72x256xf32, #tpu.memory_space<vmem>>, vector<8x256xf32>
    %199 = arith.mulf %172, %198 : vector<8x256xf32>
    %c40_202 = arith.constant 40 : index
    %c0_203 = arith.constant 0 : index
    %200 = vector.load %arg10[%c40_202, %c0_203] : memref<72x256xf32, #tpu.memory_space<vmem>>, vector<8x256xf32>
    %201 = arith.mulf %199, %200 : vector<8x256xf32>
    %c328 = arith.constant 328 : index
    %c0_204 = arith.constant 0 : index
    %202 = vector.load %arg12[%c328, %c0_204] : memref<584x256xf32, #tpu.memory_space<vmem>>, vector<8x256xf32>
    tpu.vector_store %arg12[%c328, %c0_204], %201 {strides = array<i32>} : memref<584x256xf32, #tpu.memory_space<vmem>>, vector<8x256xf32>,
    %c56_205 = arith.constant 56 : index
    %c0_206 = arith.constant 0 : index
    %203 = vector.load %arg10[%c56_205, %c0_206] : memref<72x256xf32, #tpu.memory_space<vmem>>, vector<8x256xf32>
    %204 = arith.mulf %199, %203 : vector<8x256xf32>
    %c336 = arith.constant 336 : index
    %c0_207 = arith.constant 0 : index
    %205 = vector.load %arg12[%c336, %c0_207] : memref<584x256xf32, #tpu.memory_space<vmem>>, vector<8x256xf32>
    tpu.vector_store %arg12[%c336, %c0_207], %204 {strides = array<i32>} : memref<584x256xf32, #tpu.memory_space<vmem>>, vector<8x256xf32>,
    %c56_208 = arith.constant 56 : index
    %c0_209 = arith.constant 0 : index
    %206 = vector.load %arg10[%c56_208, %c0_209] : memref<72x256xf32, #tpu.memory_space<vmem>>, vector<8x256xf32>
    %207 = arith.mulf %172, %206 : vector<8x256xf32>
    %c32_210 = arith.constant 32 : index
    %c0_211 = arith.constant 0 : index
    %208 = vector.load %arg10[%c32_210, %c0_211] : memref<72x256xf32, #tpu.memory_space<vmem>>, vector<8x256xf32>
    %209 = arith.mulf %207, %208 : vector<8x256xf32>
    %c344 = arith.constant 344 : index
    %c0_212 = arith.constant 0 : index
    %210 = vector.load %arg12[%c344, %c0_212] : memref<584x256xf32, #tpu.memory_space<vmem>>, vector<8x256xf32>
    tpu.vector_store %arg12[%c344, %c0_212], %209 {strides = array<i32>} : memref<584x256xf32, #tpu.memory_space<vmem>>, vector<8x256xf32>,
    %c40_213 = arith.constant 40 : index
    %c0_214 = arith.constant 0 : index
    %211 = vector.load %arg10[%c40_213, %c0_214] : memref<72x256xf32, #tpu.memory_space<vmem>>, vector<8x256xf32>
    %212 = arith.mulf %207, %211 : vector<8x256xf32>
    %c352 = arith.constant 352 : index
    %c0_215 = arith.constant 0 : index
    %213 = vector.load %arg12[%c352, %c0_215] : memref<584x256xf32, #tpu.memory_space<vmem>>, vector<8x256xf32>
    tpu.vector_store %arg12[%c352, %c0_215], %212 {strides = array<i32>} : memref<584x256xf32, #tpu.memory_space<vmem>>, vector<8x256xf32>,
    %c48_216 = arith.constant 48 : index
    %c0_217 = arith.constant 0 : index
    %214 = vector.load %arg10[%c48_216, %c0_217] : memref<72x256xf32, #tpu.memory_space<vmem>>, vector<8x256xf32>
    %215 = arith.mulf %207, %214 : vector<8x256xf32>
    %c360 = arith.constant 360 : index
    %c0_218 = arith.constant 0 : index
    %216 = vector.load %arg12[%c360, %c0_218] : memref<584x256xf32, #tpu.memory_space<vmem>>, vector<8x256xf32>
    tpu.vector_store %arg12[%c360, %c0_218], %215 {strides = array<i32>} : memref<584x256xf32, #tpu.memory_space<vmem>>, vector<8x256xf32>,
    %c64_219 = arith.constant 64 : index
    %c0_220 = arith.constant 0 : index
    %217 = vector.load %arg10[%c64_219, %c0_220] : memref<72x256xf32, #tpu.memory_space<vmem>>, vector<8x256xf32>
    %218 = arith.mulf %207, %217 : vector<8x256xf32>
    %c368 = arith.constant 368 : index
    %c0_221 = arith.constant 0 : index
    %219 = vector.load %arg12[%c368, %c0_221] : memref<584x256xf32, #tpu.memory_space<vmem>>, vector<8x256xf32>
    tpu.vector_store %arg12[%c368, %c0_221], %218 {strides = array<i32>} : memref<584x256xf32, #tpu.memory_space<vmem>>, vector<8x256xf32>,
    %c64_222 = arith.constant 64 : index
    %c0_223 = arith.constant 0 : index
    %220 = vector.load %arg10[%c64_222, %c0_223] : memref<72x256xf32, #tpu.memory_space<vmem>>, vector<8x256xf32>
    %221 = arith.mulf %172, %220 : vector<8x256xf32>
    %c32_224 = arith.constant 32 : index
    %c0_225 = arith.constant 0 : index
    %222 = vector.load %arg10[%c32_224, %c0_225] : memref<72x256xf32, #tpu.memory_space<vmem>>, vector<8x256xf32>
    %223 = arith.mulf %221, %222 : vector<8x256xf32>
    %c376 = arith.constant 376 : index
    %c0_226 = arith.constant 0 : index
    %224 = vector.load %arg12[%c376, %c0_226] : memref<584x256xf32, #tpu.memory_space<vmem>>, vector<8x256xf32>
    tpu.vector_store %arg12[%c376, %c0_226], %223 {strides = array<i32>} : memref<584x256xf32, #tpu.memory_space<vmem>>, vector<8x256xf32>,
    %c40_227 = arith.constant 40 : index
    %c0_228 = arith.constant 0 : index
    %225 = vector.load %arg10[%c40_227, %c0_228] : memref<72x256xf32, #tpu.memory_space<vmem>>, vector<8x256xf32>
    %226 = arith.mulf %221, %225 : vector<8x256xf32>
    %c384 = arith.constant 384 : index
    %c0_229 = arith.constant 0 : index
    %227 = vector.load %arg12[%c384, %c0_229] : memref<584x256xf32, #tpu.memory_space<vmem>>, vector<8x256xf32>
    tpu.vector_store %arg12[%c384, %c0_229], %226 {strides = array<i32>} : memref<584x256xf32, #tpu.memory_space<vmem>>, vector<8x256xf32>,
    %c56_230 = arith.constant 56 : index
    %c0_231 = arith.constant 0 : index
    %228 = vector.load %arg10[%c56_230, %c0_231] : memref<72x256xf32, #tpu.memory_space<vmem>>, vector<8x256xf32>
    %229 = arith.mulf %221, %228 : vector<8x256xf32>
    %c392 = arith.constant 392 : index
    %c0_232 = arith.constant 0 : index
    %230 = vector.load %arg12[%c392, %c0_232] : memref<584x256xf32, #tpu.memory_space<vmem>>, vector<8x256xf32>
    tpu.vector_store %arg12[%c392, %c0_232], %229 {strides = array<i32>} : memref<584x256xf32, #tpu.memory_space<vmem>>, vector<8x256xf32>,
    %c64_233 = arith.constant 64 : index
    %c0_234 = arith.constant 0 : index
    %231 = vector.load %arg11[%c64_233, %c0_234] : memref<72x256xf32, #tpu.memory_space<vmem>>, vector<8x256xf32>
    %c32_235 = arith.constant 32 : index
    %c0_236 = arith.constant 0 : index
    %232 = vector.load %arg10[%c32_235, %c0_236] : memref<72x256xf32, #tpu.memory_space<vmem>>, vector<8x256xf32>
    %233 = arith.mulf %231, %232 : vector<8x256xf32>
    %c32_237 = arith.constant 32 : index
    %c0_238 = arith.constant 0 : index
    %234 = vector.load %arg10[%c32_237, %c0_238] : memref<72x256xf32, #tpu.memory_space<vmem>>, vector<8x256xf32>
    %235 = arith.mulf %233, %234 : vector<8x256xf32>
    %c400 = arith.constant 400 : index
    %c0_239 = arith.constant 0 : index
    %236 = vector.load %arg12[%c400, %c0_239] : memref<584x256xf32, #tpu.memory_space<vmem>>, vector<8x256xf32>
    tpu.vector_store %arg12[%c400, %c0_239], %235 {strides = array<i32>} : memref<584x256xf32, #tpu.memory_space<vmem>>, vector<8x256xf32>,
    %c40_240 = arith.constant 40 : index
    %c0_241 = arith.constant 0 : index
    %237 = vector.load %arg10[%c40_240, %c0_241] : memref<72x256xf32, #tpu.memory_space<vmem>>, vector<8x256xf32>
    %238 = arith.mulf %233, %237 : vector<8x256xf32>
    %c408 = arith.constant 408 : index
    %c0_242 = arith.constant 0 : index
    %239 = vector.load %arg12[%c408, %c0_242] : memref<584x256xf32, #tpu.memory_space<vmem>>, vector<8x256xf32>
    tpu.vector_store %arg12[%c408, %c0_242], %238 {strides = array<i32>} : memref<584x256xf32, #tpu.memory_space<vmem>>, vector<8x256xf32>,
    %c48_243 = arith.constant 48 : index
    %c0_244 = arith.constant 0 : index
    %240 = vector.load %arg10[%c48_243, %c0_244] : memref<72x256xf32, #tpu.memory_space<vmem>>, vector<8x256xf32>
    %241 = arith.mulf %233, %240 : vector<8x256xf32>
    %c416 = arith.constant 416 : index
    %c0_245 = arith.constant 0 : index
    %242 = vector.load %arg12[%c416, %c0_245] : memref<584x256xf32, #tpu.memory_space<vmem>>, vector<8x256xf32>
    tpu.vector_store %arg12[%c416, %c0_245], %241 {strides = array<i32>} : memref<584x256xf32, #tpu.memory_space<vmem>>, vector<8x256xf32>,
    %c56_246 = arith.constant 56 : index
    %c0_247 = arith.constant 0 : index
    %243 = vector.load %arg10[%c56_246, %c0_247] : memref<72x256xf32, #tpu.memory_space<vmem>>, vector<8x256xf32>
    %244 = arith.mulf %233, %243 : vector<8x256xf32>
    %c424 = arith.constant 424 : index
    %c0_248 = arith.constant 0 : index
    %245 = vector.load %arg12[%c424, %c0_248] : memref<584x256xf32, #tpu.memory_space<vmem>>, vector<8x256xf32>
    tpu.vector_store %arg12[%c424, %c0_248], %244 {strides = array<i32>} : memref<584x256xf32, #tpu.memory_space<vmem>>, vector<8x256xf32>,
    %c40_249 = arith.constant 40 : index
    %c0_250 = arith.constant 0 : index
    %246 = vector.load %arg10[%c40_249, %c0_250] : memref<72x256xf32, #tpu.memory_space<vmem>>, vector<8x256xf32>
    %247 = arith.mulf %231, %246 : vector<8x256xf32>
    %c32_251 = arith.constant 32 : index
    %c0_252 = arith.constant 0 : index
    %248 = vector.load %arg10[%c32_251, %c0_252] : memref<72x256xf32, #tpu.memory_space<vmem>>, vector<8x256xf32>
    %249 = arith.mulf %247, %248 : vector<8x256xf32>
    %c432 = arith.constant 432 : index
    %c0_253 = arith.constant 0 : index
    %250 = vector.load %arg12[%c432, %c0_253] : memref<584x256xf32, #tpu.memory_space<vmem>>, vector<8x256xf32>
    tpu.vector_store %arg12[%c432, %c0_253], %249 {strides = array<i32>} : memref<584x256xf32, #tpu.memory_space<vmem>>, vector<8x256xf32>,
    %c40_254 = arith.constant 40 : index
    %c0_255 = arith.constant 0 : index
    %251 = vector.load %arg10[%c40_254, %c0_255] : memref<72x256xf32, #tpu.memory_space<vmem>>, vector<8x256xf32>
    %252 = arith.mulf %247, %251 : vector<8x256xf32>
    %c440 = arith.constant 440 : index
    %c0_256 = arith.constant 0 : index
    %253 = vector.load %arg12[%c440, %c0_256] : memref<584x256xf32, #tpu.memory_space<vmem>>, vector<8x256xf32>
    tpu.vector_store %arg12[%c440, %c0_256], %252 {strides = array<i32>} : memref<584x256xf32, #tpu.memory_space<vmem>>, vector<8x256xf32>,
    %c48_257 = arith.constant 48 : index
    %c0_258 = arith.constant 0 : index
    %254 = vector.load %arg10[%c48_257, %c0_258] : memref<72x256xf32, #tpu.memory_space<vmem>>, vector<8x256xf32>
    %255 = arith.mulf %247, %254 : vector<8x256xf32>
    %c448 = arith.constant 448 : index
    %c0_259 = arith.constant 0 : index
    %256 = vector.load %arg12[%c448, %c0_259] : memref<584x256xf32, #tpu.memory_space<vmem>>, vector<8x256xf32>
    tpu.vector_store %arg12[%c448, %c0_259], %255 {strides = array<i32>} : memref<584x256xf32, #tpu.memory_space<vmem>>, vector<8x256xf32>,
    %c56_260 = arith.constant 56 : index
    %c0_261 = arith.constant 0 : index
    %257 = vector.load %arg10[%c56_260, %c0_261] : memref<72x256xf32, #tpu.memory_space<vmem>>, vector<8x256xf32>
    %258 = arith.mulf %247, %257 : vector<8x256xf32>
    %c456 = arith.constant 456 : index
    %c0_262 = arith.constant 0 : index
    %259 = vector.load %arg12[%c456, %c0_262] : memref<584x256xf32, #tpu.memory_space<vmem>>, vector<8x256xf32>
    tpu.vector_store %arg12[%c456, %c0_262], %258 {strides = array<i32>} : memref<584x256xf32, #tpu.memory_space<vmem>>, vector<8x256xf32>,
    %c64_263 = arith.constant 64 : index
    %c0_264 = arith.constant 0 : index
    %260 = vector.load %arg10[%c64_263, %c0_264] : memref<72x256xf32, #tpu.memory_space<vmem>>, vector<8x256xf32>
    %261 = arith.mulf %247, %260 : vector<8x256xf32>
    %c464 = arith.constant 464 : index
    %c0_265 = arith.constant 0 : index
    %262 = vector.load %arg12[%c464, %c0_265] : memref<584x256xf32, #tpu.memory_space<vmem>>, vector<8x256xf32>
    tpu.vector_store %arg12[%c464, %c0_265], %261 {strides = array<i32>} : memref<584x256xf32, #tpu.memory_space<vmem>>, vector<8x256xf32>,
    %c48_266 = arith.constant 48 : index
    %c0_267 = arith.constant 0 : index
    %263 = vector.load %arg10[%c48_266, %c0_267] : memref<72x256xf32, #tpu.memory_space<vmem>>, vector<8x256xf32>
    %264 = arith.mulf %231, %263 : vector<8x256xf32>
    %c32_268 = arith.constant 32 : index
    %c0_269 = arith.constant 0 : index
    %265 = vector.load %arg10[%c32_268, %c0_269] : memref<72x256xf32, #tpu.memory_space<vmem>>, vector<8x256xf32>
    %266 = arith.mulf %264, %265 : vector<8x256xf32>
    %c472 = arith.constant 472 : index
    %c0_270 = arith.constant 0 : index
    %267 = vector.load %arg12[%c472, %c0_270] : memref<584x256xf32, #tpu.memory_space<vmem>>, vector<8x256xf32>
    tpu.vector_store %arg12[%c472, %c0_270], %266 {strides = array<i32>} : memref<584x256xf32, #tpu.memory_space<vmem>>, vector<8x256xf32>,
    %c40_271 = arith.constant 40 : index
    %c0_272 = arith.constant 0 : index
    %268 = vector.load %arg10[%c40_271, %c0_272] : memref<72x256xf32, #tpu.memory_space<vmem>>, vector<8x256xf32>
    %269 = arith.mulf %264, %268 : vector<8x256xf32>
    %c480 = arith.constant 480 : index
    %c0_273 = arith.constant 0 : index
    %270 = vector.load %arg12[%c480, %c0_273] : memref<584x256xf32, #tpu.memory_space<vmem>>, vector<8x256xf32>
    tpu.vector_store %arg12[%c480, %c0_273], %269 {strides = array<i32>} : memref<584x256xf32, #tpu.memory_space<vmem>>, vector<8x256xf32>,
    %c48_274 = arith.constant 48 : index
    %c0_275 = arith.constant 0 : index
    %271 = vector.load %arg10[%c48_274, %c0_275] : memref<72x256xf32, #tpu.memory_space<vmem>>, vector<8x256xf32>
    %272 = arith.mulf %264, %271 : vector<8x256xf32>
    %c488 = arith.constant 488 : index
    %c0_276 = arith.constant 0 : index
    %273 = vector.load %arg12[%c488, %c0_276] : memref<584x256xf32, #tpu.memory_space<vmem>>, vector<8x256xf32>
    tpu.vector_store %arg12[%c488, %c0_276], %272 {strides = array<i32>} : memref<584x256xf32, #tpu.memory_space<vmem>>, vector<8x256xf32>,
    %c56_277 = arith.constant 56 : index
    %c0_278 = arith.constant 0 : index
    %274 = vector.load %arg10[%c56_277, %c0_278] : memref<72x256xf32, #tpu.memory_space<vmem>>, vector<8x256xf32>
    %275 = arith.mulf %264, %274 : vector<8x256xf32>
    %c496 = arith.constant 496 : index
    %c0_279 = arith.constant 0 : index
    %276 = vector.load %arg12[%c496, %c0_279] : memref<584x256xf32, #tpu.memory_space<vmem>>, vector<8x256xf32>
    tpu.vector_store %arg12[%c496, %c0_279], %275 {strides = array<i32>} : memref<584x256xf32, #tpu.memory_space<vmem>>, vector<8x256xf32>,
    %c64_280 = arith.constant 64 : index
    %c0_281 = arith.constant 0 : index
    %277 = vector.load %arg10[%c64_280, %c0_281] : memref<72x256xf32, #tpu.memory_space<vmem>>, vector<8x256xf32>
    %278 = arith.mulf %264, %277 : vector<8x256xf32>
    %c504 = arith.constant 504 : index
    %c0_282 = arith.constant 0 : index
    %279 = vector.load %arg12[%c504, %c0_282] : memref<584x256xf32, #tpu.memory_space<vmem>>, vector<8x256xf32>
    tpu.vector_store %arg12[%c504, %c0_282], %278 {strides = array<i32>} : memref<584x256xf32, #tpu.memory_space<vmem>>, vector<8x256xf32>,
    %c56_283 = arith.constant 56 : index
    %c0_284 = arith.constant 0 : index
    %280 = vector.load %arg10[%c56_283, %c0_284] : memref<72x256xf32, #tpu.memory_space<vmem>>, vector<8x256xf32>
    %281 = arith.mulf %231, %280 : vector<8x256xf32>
    %c32_285 = arith.constant 32 : index
    %c0_286 = arith.constant 0 : index
    %282 = vector.load %arg10[%c32_285, %c0_286] : memref<72x256xf32, #tpu.memory_space<vmem>>, vector<8x256xf32>
    %283 = arith.mulf %281, %282 : vector<8x256xf32>
    %c512 = arith.constant 512 : index
    %c0_287 = arith.constant 0 : index
    %284 = vector.load %arg12[%c512, %c0_287] : memref<584x256xf32, #tpu.memory_space<vmem>>, vector<8x256xf32>
    tpu.vector_store %arg12[%c512, %c0_287], %283 {strides = array<i32>} : memref<584x256xf32, #tpu.memory_space<vmem>>, vector<8x256xf32>,
    %c40_288 = arith.constant 40 : index
    %c0_289 = arith.constant 0 : index
    %285 = vector.load %arg10[%c40_288, %c0_289] : memref<72x256xf32, #tpu.memory_space<vmem>>, vector<8x256xf32>
    %286 = arith.mulf %281, %285 : vector<8x256xf32>
    %c520 = arith.constant 520 : index
    %c0_290 = arith.constant 0 : index
    %287 = vector.load %arg12[%c520, %c0_290] : memref<584x256xf32, #tpu.memory_space<vmem>>, vector<8x256xf32>
    tpu.vector_store %arg12[%c520, %c0_290], %286 {strides = array<i32>} : memref<584x256xf32, #tpu.memory_space<vmem>>, vector<8x256xf32>,
    %c48_291 = arith.constant 48 : index
    %c0_292 = arith.constant 0 : index
    %288 = vector.load %arg10[%c48_291, %c0_292] : memref<72x256xf32, #tpu.memory_space<vmem>>, vector<8x256xf32>
    %289 = arith.mulf %281, %288 : vector<8x256xf32>
    %c528 = arith.constant 528 : index
    %c0_293 = arith.constant 0 : index
    %290 = vector.load %arg12[%c528, %c0_293] : memref<584x256xf32, #tpu.memory_space<vmem>>, vector<8x256xf32>
    tpu.vector_store %arg12[%c528, %c0_293], %289 {strides = array<i32>} : memref<584x256xf32, #tpu.memory_space<vmem>>, vector<8x256xf32>,
    %c56_294 = arith.constant 56 : index
    %c0_295 = arith.constant 0 : index
    %291 = vector.load %arg10[%c56_294, %c0_295] : memref<72x256xf32, #tpu.memory_space<vmem>>, vector<8x256xf32>
    %292 = arith.mulf %281, %291 : vector<8x256xf32>
    %c536 = arith.constant 536 : index
    %c0_296 = arith.constant 0 : index
    %293 = vector.load %arg12[%c536, %c0_296] : memref<584x256xf32, #tpu.memory_space<vmem>>, vector<8x256xf32>
    tpu.vector_store %arg12[%c536, %c0_296], %292 {strides = array<i32>} : memref<584x256xf32, #tpu.memory_space<vmem>>, vector<8x256xf32>,
    %c64_297 = arith.constant 64 : index
    %c0_298 = arith.constant 0 : index
    %294 = vector.load %arg10[%c64_297, %c0_298] : memref<72x256xf32, #tpu.memory_space<vmem>>, vector<8x256xf32>
    %295 = arith.mulf %281, %294 : vector<8x256xf32>
    %c544 = arith.constant 544 : index
    %c0_299 = arith.constant 0 : index
    %296 = vector.load %arg12[%c544, %c0_299] : memref<584x256xf32, #tpu.memory_space<vmem>>, vector<8x256xf32>
    tpu.vector_store %arg12[%c544, %c0_299], %295 {strides = array<i32>} : memref<584x256xf32, #tpu.memory_space<vmem>>, vector<8x256xf32>,
    %c64_300 = arith.constant 64 : index
    %c0_301 = arith.constant 0 : index
    %297 = vector.load %arg10[%c64_300, %c0_301] : memref<72x256xf32, #tpu.memory_space<vmem>>, vector<8x256xf32>
    %298 = arith.mulf %231, %297 : vector<8x256xf32>
    %c40_302 = arith.constant 40 : index
    %c0_303 = arith.constant 0 : index
    %299 = vector.load %arg10[%c40_302, %c0_303] : memref<72x256xf32, #tpu.memory_space<vmem>>, vector<8x256xf32>
    %300 = arith.mulf %298, %299 : vector<8x256xf32>
    %c552 = arith.constant 552 : index
    %c0_304 = arith.constant 0 : index
    %301 = vector.load %arg12[%c552, %c0_304] : memref<584x256xf32, #tpu.memory_space<vmem>>, vector<8x256xf32>
    tpu.vector_store %arg12[%c552, %c0_304], %300 {strides = array<i32>} : memref<584x256xf32, #tpu.memory_space<vmem>>, vector<8x256xf32>,
    %c48_305 = arith.constant 48 : index
    %c0_306 = arith.constant 0 : index
    %302 = vector.load %arg10[%c48_305, %c0_306] : memref<72x256xf32, #tpu.memory_space<vmem>>, vector<8x256xf32>
    %303 = arith.mulf %298, %302 : vector<8x256xf32>
    %c560 = arith.constant 560 : index
    %c0_307 = arith.constant 0 : index
    %304 = vector.load %arg12[%c560, %c0_307] : memref<584x256xf32, #tpu.memory_space<vmem>>, vector<8x256xf32>
    tpu.vector_store %arg12[%c560, %c0_307], %303 {strides = array<i32>} : memref<584x256xf32, #tpu.memory_space<vmem>>, vector<8x256xf32>,
    %c56_308 = arith.constant 56 : index
    %c0_309 = arith.constant 0 : index
    %305 = vector.load %arg10[%c56_308, %c0_309] : memref<72x256xf32, #tpu.memory_space<vmem>>, vector<8x256xf32>
    %306 = arith.mulf %298, %305 : vector<8x256xf32>
    %c568 = arith.constant 568 : index
    %c0_310 = arith.constant 0 : index
    %307 = vector.load %arg12[%c568, %c0_310] : memref<584x256xf32, #tpu.memory_space<vmem>>, vector<8x256xf32>
    tpu.vector_store %arg12[%c568, %c0_310], %306 {strides = array<i32>} : memref<584x256xf32, #tpu.memory_space<vmem>>, vector<8x256xf32>,
    %c64_311 = arith.constant 64 : index
    %c0_312 = arith.constant 0 : index
    %308 = vector.load %arg10[%c64_311, %c0_312] : memref<72x256xf32, #tpu.memory_space<vmem>>, vector<8x256xf32>
    %309 = arith.mulf %298, %308 : vector<8x256xf32>
    %c576 = arith.constant 576 : index
    %c0_313 = arith.constant 0 : index
    %310 = vector.load %arg12[%c576, %c0_313] : memref<584x256xf32, #tpu.memory_space<vmem>>, vector<8x256xf32>
    tpu.vector_store %arg12[%c576, %c0_313], %309 {strides = array<i32>} : memref<584x256xf32, #tpu.memory_space<vmem>>, vector<8x256xf32>,
    %c0_314 = arith.constant 0 : index
    %c0_315 = arith.constant 0 : index
    %311 = vector.load %arg7[%c0_314, %c0_315] : memref<16x584xf32, #tpu.memory_space<vmem>>, vector<16x584xf32>
    %c0_316 = arith.constant 0 : index
    %c0_317 = arith.constant 0 : index
    %312 = vector.load %arg12[%c0_316, %c0_317] : memref<584x256xf32, #tpu.memory_space<vmem>>, vector<584x256xf32>
    %cst_318 = arith.constant dense<0.000000e+00> : vector<16x256xf32>
    %313 = tpu.matmul %311, %312, %cst_318 {dimension_numbers = #tpu.dot_dimension_numbers<[1], [0], [0], [1], [0, 0, 1, 1], [], []>} : vector<16x584xf32>, vector<584x256xf32>, vector<16x256xf32> -> vector<16x256xf32>
    %314 = tpu.iota {dimensions = array<i32: 0>} : vector<128x256xi32>
    %c0_319 = arith.constant 0 : index
    %c0_320 = arith.constant 0 : index
    %315 = vector.load %arg3[%c0_319, %c0_320] : memref<1x256xi32, #tpu.memory_space<vmem>>, vector<1x256xi32>
    %316 = vector.broadcast %315 : vector<1x256xi32> to vector<128x256xi32>
    %317 = arith.cmpi eq, %314, %316 : vector<128x256xi32>
    %318 = arith.extui %317 : vector<128x256xi1> to vector<128x256xi32>
    %319 = arith.sitofp %318 : vector<128x256xi32> to vector<128x256xf32>
    %c0_321 = arith.constant 0 : index
    %c0_322 = arith.constant 0 : index
    %c0_323 = arith.constant 0 : index
    %320 = vector.load %arg9[%c0_321, %c0_322, %c0_323] : memref<1x16x128xf32, #tpu.memory_space<vmem>>, vector<1x16x128xf32>
    %321 = vector.shape_cast %320 : vector<1x16x128xf32> to vector<16x128xf32>
    %cst_324 = arith.constant dense<0.000000e+00> : vector<16x128xf32>
    %322 = tpu.matmul %313, %319, %cst_324 {dimension_numbers = #tpu.dot_dimension_numbers<[1], [1], [0], [0], [0, 0, 1, 0], [], []>} : vector<16x256xf32>, vector<128x256xf32>, vector<16x128xf32> -> vector<16x128xf32>
    %323 = arith.addf %321, %322 : vector<16x128xf32>
    %c0_325 = arith.constant 0 : index
    %c0_326 = arith.constant 0 : index
    %c0_327 = arith.constant 0 : index
    %324 = vector.load %arg9[%c0_325, %c0_326, %c0_327] : memref<1x16x128xf32, #tpu.memory_space<vmem>>, vector<1x16x128xf32>
    %325 = vector.shape_cast %324 : vector<1x16x128xf32> to vector<16x128xf32>
    %326 = vector.shape_cast %323 : vector<16x128xf32> to vector<1x16x128xf32>
    tpu.vector_store %arg9[%c0_325, %c0_326, %c0_327], %326 {strides = array<i32>} : memref<1x16x128xf32, #tpu.memory_space<vmem>>, vector<1x16x128xf32>,
    %c1_i32 = arith.constant 1 : i32
    %327 = arith.cmpi eq, %arg1, %c1_i32 : i32
    %328 = arith.extui %327 : i1 to i32
    %c0_i32_328 = arith.constant 0 : i32
    %329 = arith.cmpi ne, %328, %c0_i32_328 : i32
    scf.if %329 {
      %c0_329 = arith.constant 0 : index
      %c0_330 = arith.constant 0 : index
      %330 = vector.load %arg8[%c0_329, %c0_330] : memref<16x16xf32, #tpu.memory_space<vmem>>, vector<16x16xf32>
      %c0_331 = arith.constant 0 : index
      %c0_332 = arith.constant 0 : index
      %c0_333 = arith.constant 0 : index
      %331 = vector.load %arg9[%c0_331, %c0_332, %c0_333] : memref<1x16x128xf32, #tpu.memory_space<vmem>>, vector<1x16x128xf32>
      %332 = vector.shape_cast %331 : vector<1x16x128xf32> to vector<16x128xf32>
      %cst_334 = arith.constant dense<0.000000e+00> : vector<16x128xf32>
      %333 = tpu.matmul %330, %332, %cst_334 {dimension_numbers = #tpu.dot_dimension_numbers<[1], [0], [0], [1], [0, 0, 1, 1], [], []>} : vector<16x16xf32>, vector<16x128xf32>, vector<16x128xf32> -> vector<16x128xf32>
      %c0_335 = arith.constant 0 : index
      %c0_336 = arith.constant 0 : index
      %c0_337 = arith.constant 0 : index
      %334 = vector.load %arg9[%c0_335, %c0_336, %c0_337] : memref<1x16x128xf32, #tpu.memory_space<vmem>>, vector<1x16x128xf32>
      %335 = vector.shape_cast %334 : vector<1x16x128xf32> to vector<16x128xf32>
      %336 = vector.shape_cast %333 : vector<16x128xf32> to vector<1x16x128xf32>
      tpu.vector_store %arg9[%c0_335, %c0_336, %c0_337], %336 {strides = array<i32>} : memref<1x16x128xf32, #tpu.memory_space<vmem>>, vector<1x16x128xf32>,
    } else {
    }
    return
  }
  func.func @transform_0(%arg0: i32, %arg1: i32) -> (i32, i32) {
    %c2_i32 = arith.constant 2 : i32
    %0 = arith.muli %arg0, %c2_i32 : i32
    %1 = arith.addi %0, %arg1 : i32
    %c0_i32 = arith.constant 0 : i32
    %c0_i32_0 = arith.constant 0 : i32
    return %1, %c0_i32 : i32, i32
  }
  func.func @transform_1(%arg0: i32, %arg1: i32) -> (i32, i32) {
    %c2_i32 = arith.constant 2 : i32
    %0 = arith.muli %arg0, %c2_i32 : i32
    %1 = arith.addi %0, %arg1 : i32
    %c0_i32 = arith.constant 0 : i32
    %c0_i32_0 = arith.constant 0 : i32
    return %c0_i32, %1 : i32, i32
  }
  func.func @transform_2(%arg0: i32, %arg1: i32) -> (i32, i32) {
    %c0_i32 = arith.constant 0 : i32
    %c0_i32_0 = arith.constant 0 : i32
    %c0_i32_1 = arith.constant 0 : i32
    return %c0_i32, %c0_i32_0 : i32, i32
  }
  func.func @transform_3(%arg0: i32, %arg1: i32) -> (i32, i32) {
    %c0_i32 = arith.constant 0 : i32
    %c0_i32_0 = arith.constant 0 : i32
    %c0_i32_1 = arith.constant 0 : i32
    return %c0_i32, %c0_i32_0 : i32, i32
  }
  func.func @transform_4(%arg0: i32, %arg1: i32) -> (i32, i32) {
    %c0_i32 = arith.constant 0 : i32
    %c0_i32_0 = arith.constant 0 : i32
    %c0_i32_1 = arith.constant 0 : i32
    return %c0_i32, %c0_i32_0 : i32, i32
  }
  func.func @transform_5(%arg0: i32, %arg1: i32) -> (i32, i32) {
    %c0_i32 = arith.constant 0 : i32
    %c0_i32_0 = arith.constant 0 : i32
    %c0_i32_1 = arith.constant 0 : i32
    return %c0_i32, %c0_i32_0 : i32, i32
  }
  func.func @transform_6(%arg0: i32, %arg1: i32) -> (i32, i32) {
    %c0_i32 = arith.constant 0 : i32
    %c0_i32_0 = arith.constant 0 : i32
    %c0_i32_1 = arith.constant 0 : i32
    return %c0_i32, %c0_i32_0 : i32, i32
  }
  func.func @transform_7(%arg0: i32, %arg1: i32) -> (i32, i32, i32) {
    %c0_i32 = arith.constant 0 : i32
    %c0_i32_0 = arith.constant 0 : i32
    %c0_i32_1 = arith.constant 0 : i32
    return %arg0, %c0_i32, %c0_i32_0 : i32, i32, i32
  }
}

</mosaic_0001>

<bundles_post_ra>
// kernel: cart_tensor_out_forward.1
= control target key start
LH: loop header
LB: loop body
LE: loop exit
PB: predicated region body
PF: predicated region fallthrough
CT: control target
= control target key end

     0   :  { %s2652_s24 = smov 0   ;;  %s2654_s25 = smov 0   ;;  %s3939_s0 = inlined_call_operand.vmem [shape: f32[1024,128], index: 0, kind: input, shape index: {}]   ;;  %s3940_s1 = inlined_call_operand.vmem [shape: s32[1,1024], index: 1, kind: input, shape index: {}]   ;;  %s3941_s2 = inlined_call_operand.vmem [shape: f32[88,128], index: 2, kind: input, shape index: {}]   ;;  %s3942_s3 = inlined_call_operand.vmem [shape: f32[72,16], index: 3, kind: input, shape index: {}]   ;;  %s3943_s4 = inlined_call_operand.vmem [shape: f32[72,1], index: 4, kind: input, shape index: {}]   ;;  %s3944_s5 = inlined_call_operand.vmem [shape: f32[16,584], index: 5, kind: input, shape index: {}]   ;;  %s3945_s6 = inlined_call_operand.vmem [shape: f32[16,16], index: 6, kind: input, shape index: {}]   ;;  %s3946_s7 = inlined_call_operand.vmem [shape: f32[2,16,128], index: 7, kind: output, shape index: {}]  }
   0x1   :  { %s2656_s26 = smov 0   ;;  %s2658_s27 = smov 0  }
   0x2   :  { %s2660_s28 = smov 0  }
   0x3 LB: > { %s26_s29 = sadd.s32 1, %s2598_s26  ;;  %s29_s30 = sadd.s32 1, %s2602_s27  ;;  %s2606_s28 = sphi %s2660_s28, %s17_s28   ;;  %s2602_s27 = sphi %s2658_s27, %s4098_s27   ;;  %s2598_s26 = sphi %s2656_s26, %s4097_s26   ;;  %s2594_s25 = sphi %s2654_s25, %s4096_s25   ;;  %s2590_s24 = sphi %s2652_s24, %s4095_s24  }
   0x4   : > { %p27_p0 = scmp.ge.s32.totalorder %s26_s29, 2  ;;  %p2123_p1 = scmp.ge.s32.totalorder %s2606_s28, 1 }
   0x5   : > { %p276_p2 = scmp.lt.s32.totalorder %s2606_s28, 5 }
   0x6   : > { %s4100_s29 = smov (%p27_p0, %s26_s29), 0  ;;  %s4102_s30 = smov (!%p27_p0, %s29_s30), %s2602_s27 }
   0x7   : > { %p277_p3 = pnand %p2123_p1, %p276_p2  ;;  %p31_p4 = scmp.ge.s32.totalorder %s4102_s30, 2 }
   0x9   : > { %s4104_s30 = smov (%p31_p4, %s4102_s30), 0  ;;  %280 = sbr.rel (%p277_p3) target bundleno = 1412 (0x584), region = 48 }
  0x10   : > { %s2124_s8 = sshll.u32 %s2594_s25, 1  ;;  %p335_p5 = scmp.lt.s32.totalorder %s2594_s25, 1 }
  0x11   : > { %s317_s9 = sadd.s32 %s2590_s24, %s2124_s8  ;;  %p2131_p8 = scmp.ne.s32.totalorder %s2590_s24, 0 }
  0x12   : > { %s2125_s10 = sshll.u32 %s317_s9, 5  ;;  %s2128_s11 = sshll.u32 %s317_s9, 1  ;;  %v2608_v0 = vmov (!%p2131_p8), 0.0  }
  0x13   : > { %p319_p6 = scmp.lt.s32.totalorder %s2125_s10, 127  ;;  %p329_p7 = scmp.lt.s32.totalorder %s2128_s11, 7 }
  0x14   : > { %s4106_s25 = smov (!%p335_p5, %s2594_s25), 1  ;;  %343 = sbr.rel (%p2131_p8) target bundleno = 27 (0x1b), region = 52 }
  0x15   : > { %s4108_s10 = smov (!%p319_p6, %s2125_s10), 127  ;;  %s4110_s11 = smov (!%p329_p7, %s2128_s11), 7 }
  0x16   : > { %s2126_s12 = sshll.u32 %s4108_s10, 3  ;;  %s2216_s13 = sshll.u32 %s4106_s25, 4 }
  0x17   : > { %s2690_s16 = scalar_lea.vmem %s3939_s0, %s2126_s12  ;;  %s331_s19 = scalar_lea.vmem %s3940_s1, %s4110_s11 }
  0x18   : > { %s2699_s22 = scalar_lea.vmem %s3946_s7, %s2216_s13 }
  0x19   : > { %344 = vst [vmem:[%s2699_s22] sm:$0xff] (!%p2131_p8), %v2608_v0  ;;  %345 = vst [vmem:[%s2699_s22 + $0x8] sm:$0xff] (!%p2131_p8), %v2608_v0 }
  0x1b PF: > { %v373_v1 = vld [vmem:[%s2690_s16 + $0x80] sm:$0xff]  ;;  %v374_v2 = vld [vmem:[%s2690_s16 + $0x88] sm:$0xff]  ;;  %v375_v6 = vld [vmem:[%s2690_s16 + $0x90] sm:$0xff]  ;;  %v3947_v60 = vmov 0.0   ;;  %v2610_v62 = vmov 0   ;;  %vm629_vm0 = vcmask 130048  }
  0x1c   : > { %v357_v3 = vld [vmem:[%s2690_s16] sm:$0xff]  ;;  %v2282_v4 = vpack.c.bf16 %v374_v2, %v373_v1  ;;  %v358_v5 = vld [vmem:[%s2690_s16 + $0x8] sm:$0xff]  ;;  %v376_v7 = vld [vmem:[%s2690_s16 + $0x98] sm:$0xff]  ;;  %721 = vmatprep.mubr.f32.mxu1 %v3947_v60  ;;  %2550 = vset.pattern.permute.xlu0 %v2610_v62  ;;  %p2211_p9 = scmp.ne.s32.totalorder %s2590_s24, 1 }
  0x1d   : > { %v2284_v8 = vpack.c.bf16 %v358_v5, %v357_v3  ;;  %v2286_v9 = vpack.c.bf16 %v376_v7, %v375_v6  ;;  %v359_v10 = vld [vmem:[%s2690_s16 + $0x10] sm:$0xff]  ;;  %v360_v11 = vld [vmem:[%s2690_s16 + $0x18] sm:$0xff]  ;;  %v377_v12 = vld [vmem:[%s2690_s16 + $0xa0] sm:$0xff]  ;;  %2551 = vset.pattern.permute.xlu1 %v2610_v62 }
  0x1e   : > { %2283 = vmatprep.subr.bf16.mxu0 %v2282_v4  ;;  %v378_v13 = vld [vmem:[%s2690_s16 + $0xa8] sm:$0xff]  ;;  %v2288_v14 = vpack.c.bf16 %v360_v11, %v359_v10  ;;  %v346_v16 = vld [vmem:[%s3941_s2] sm:$0xff]  ;;  %v379_v19 = vld [vmem:[%s2690_s16 + $0xb0] sm:$0xff] }
  0x1f   : > { %2285 = vmatpush3.bf16.xpose.msra.mxu0 %v2284_v8  ;;  %v2290_v15 = vpack.c.bf16 %v378_v13, %v377_v12  ;;  %2249 = vmatprep.mubr.f32.mxu0 %v346_v16  ;;  %v361_v17 = vld [vmem:[%s2690_s16 + $0x20] sm:$0xff]  ;;  %v362_v18 = vld [vmem:[%s2690_s16 + $0x28] sm:$0xff]  ;;  %v380_v20 = vld [vmem:[%s2690_s16 + $0xb8] sm:$0xff] }
  0x20   : > { %2287 = vmatprep.subr.bf16.mxu0 %v2286_v9  ;;  %v2292_v21 = vpack.c.bf16 %v362_v18, %v361_v17  ;;  %v2294_v22 = vpack.c.bf16 %v380_v20, %v379_v19  ;;  %v363_v23 = vld [vmem:[%s2690_s16 + $0x30] sm:$0xff]  ;;  %v364_v24 = vld [vmem:[%s2690_s16 + $0x38] sm:$0xff]  ;;  %v381_v25 = vld [vmem:[%s2690_s16 + $0xc0] sm:$0xff] }
  0x21   : > { %v382_v26 = vld [vmem:[%s2690_s16 + $0xc8] sm:$0xff]  ;;  %v2296_v27 = vpack.c.bf16 %v364_v24, %v363_v23  ;;  %v365_v29 = vld [vmem:[%s2690_s16 + $0x40] sm:$0xff]  ;;  %v383_v31 = vld [vmem:[%s2690_s16 + $0xd0] sm:$0xff] }
  0x22   : > { %v2298_v28 = vpack.c.bf16 %v382_v26, %v381_v25  ;;  %v366_v30 = vld [vmem:[%s2690_s16 + $0x48] sm:$0xff]  ;;  %v384_v32 = vld [vmem:[%s2690_s16 + $0xd8] sm:$0xff]  ;;  %v367_v35 = vld [vmem:[%s2690_s16 + $0x50] sm:$0xff] }
  0x23   : > { %v2300_v33 = vpack.c.bf16 %v366_v30, %v365_v29  ;;  %v2302_v34 = vpack.c.bf16 %v384_v32, %v383_v31  ;;  %v368_v36 = vld [vmem:[%s2690_s16 + $0x58] sm:$0xff]  ;;  %v385_v37 = vld [vmem:[%s2690_s16 + $0xe0] sm:$0xff]  ;;  %v386_v38 = vld [vmem:[%s2690_s16 + $0xe8] sm:$0xff] }
  0x24   : > { %v2304_v39 = vpack.c.bf16 %v368_v36, %v367_v35  ;;  %v2306_v40 = vpack.c.bf16 %v386_v38, %v385_v37  ;;  %v369_v41 = vld [vmem:[%s2690_s16 + $0x60] sm:$0xff]  ;;  %v370_v42 = vld [vmem:[%s2690_s16 + $0x68] sm:$0xff]  ;;  %v387_v43 = vld [vmem:[%s2690_s16 + $0xf0] sm:$0xff] }
  0x25   : > { %v388_v44 = vld [vmem:[%s2690_s16 + $0xf8] sm:$0xff]  ;;  %v2308_v45 = vpack.c.bf16 %v370_v42, %v369_v41  ;;  %v371_v47 = vld [vmem:[%s2690_s16 + $0x70] sm:$0xff]  ;;  %v347_v50 = vld [vmem:[%s3941_s2 + $0x8] sm:$0xff] }
  0x26   : > { %v2310_v46 = vpack.c.bf16 %v388_v44, %v387_v43  ;;  %v372_v48 = vld [vmem:[%s2690_s16 + $0x78] sm:$0xff]  ;;  %v348_v51 = vld [vmem:[%s3941_s2 + $0x10] sm:$0xff]  ;;  %v350_v53 = vld [vmem:[%s3941_s2 + $0x20] sm:$0xff] }
  0x27   : > { %2289 = vmatpush3.bf16.xpose.msra.mxu0 %v2288_v14  ;;  %v2312_v49 = vpack.c.bf16 %v372_v48, %v371_v47  ;;  %v349_v52 = vld [vmem:[%s3941_s2 + $0x18] sm:$0xff]  ;;  %v351_v54 = vld [vmem:[%s3941_s2 + $0x28] sm:$0xff]  ;;  %v352_v55 = vld [vmem:[%s3941_s2 + $0x30] sm:$0xff] }
  0x28   : > { %2291 = vmatprep.subr.bf16.mxu0 %v2290_v15  ;;  %v353_v56 = vld [vmem:[%s3941_s2 + $0x38] sm:$0xff]  ;;  %v354_v57 = vld [vmem:[%s3941_s2 + $0x40] sm:$0xff]  ;;  %v355_v58 = vld [vmem:[%s3941_s2 + $0x48] sm:$0xff] }
  0x29   : > { %v356_v59 = vld [vmem:[%s3941_s2 + $0x50] sm:$0xff]  ;;  %v575_v61 = vld [vmem:[%s3943_s4] sm:$0xff]  ;;  %v576_v0 = vld [vmem:[%s3943_s4 + $0x8] sm:$0xff] }
  0x2a   : > { %v577_v63 = vld [vmem:[%s3943_s4 + $0x10] sm:$0xff]  ;;  %586 = vperm.xlu0 %2550, %v575_v61   ;;  %v578_v1 = vld [vmem:[%s3943_s4 + $0x18] sm:$0xff]  ;;  %v579_v2 = vld [vmem:[%s3943_s4 + $0x20] sm:$0xff] }
  0x2b   : > { %596 = vperm.xlu1 %2551, %v577_v63   ;;  %v580_v3 = vld [vmem:[%s3943_s4 + $0x28] sm:$0xff]  ;;  %v581_v4 = vld [vmem:[%s3943_s4 + $0x30] sm:$0xff]  ;;  %v582_v5 = vld [vmem:[%s3943_s4 + $0x38] sm:$0xff] }
  0x2c   : > { %v583_v6 = vld [vmem:[%s3943_s4 + $0x40] sm:$0xff]  ;;  %v1353_v61 = vld [vmem:[%s3944_s5 + $0x8] sm:$0xff] }
  0x2e   : > { %591 = vperm.xlu0 %2550, %v576_v0  }
  0x2f   : > { %2293 = vmatpush3.bf16.xpose.msra.mxu0 %v2292_v21  ;;  %601 = vperm.xlu1 %2551, %v578_v1  }
  0x30   : > { %2295 = vmatprep.subr.bf16.mxu0 %v2294_v22 }
  0x32   : > { %606 = vperm.xlu0 %2550, %v579_v2  }
  0x33   : > { %611 = vperm.xlu1 %2551, %v580_v3  }
  0x36   : > { %616 = vperm.xlu0 %2550, %v581_v4  }
  0x37   : > { %2297 = vmatpush3.bf16.xpose.msra.mxu0 %v2296_v27  ;;  %621 = vperm.xlu1 %2551, %v582_v5  }
  0x38   : > { %2299 = vmatprep.subr.bf16.mxu0 %v2298_v28 }
  0x3a   : > { %626 = vperm.xlu0 %2550, %v583_v6  }
  0x3f   : > { %2301 = vmatpush3.bf16.xpose.msra.mxu0 %v2300_v33 }
  0x40   : > { %2303 = vmatprep.subr.bf16.mxu0 %v2302_v34 }
  0x47   : > { %2305 = vmatpush3.bf16.xpose.msra.mxu0 %v2304_v39 }
  0x48   : > { %2307 = vmatprep.subr.bf16.mxu0 %v2306_v40 }
  0x4f   : > { %2309 = vmatpush3.bf16.xpose.msra.mxu0 %v2308_v45 }
  0x50   : > { %2311 = vmatprep.subr.bf16.mxu0 %v2310_v46 }
  0x57   : > { %2313 = vmatpush3.bf16.xpose.msra.mxu0 %v2312_v49 }
  0x5e   : > { %2250 = vmatmul.mubr.f32.vlgmr.msra.gmra.mrb[0].mxu0 %v346_v16 }
  0x5f   : > { %2251 = vmatprep.mubr.f32.mxu0 %v347_v50 }
  0x62   : > { %2252 = vmatmul.mubr.f32.gmra.mrb[2].mxu0 %v347_v50 }
  0x63   : > { %2253 = vmatprep.mubr.f32.mxu0 %v348_v51 }
  0x66   : > { %2254 = vmatmul.mubr.f32.gmra.mrb[4].mxu0 %v348_v51  ;;  %v566_v51 = vld [vmem:[%s3942_s3] sm:$0xff] }
  0x67   : > { %2255 = vmatprep.mubr.f32.mxu0 %v349_v52 }
  0x6a   : > { %2256 = vmatmul.mubr.f32.gmra.mrb[6].mxu0 %v349_v52  ;;  %v567_v52 = vld [vmem:[%s3942_s3 + $0x8] sm:$0xff] }
  0x6b   : > { %2257 = vmatprep.mubr.f32.mxu0 %v350_v53 }
  0x6e   : > { %2258 = vmatmul.mubr.f32.gmra.mrb[8].mxu0 %v350_v53  ;;  %v568_v53 = vld [vmem:[%s3942_s3 + $0x10] sm:$0xff] }
  0x6f   : > { %2259 = vmatprep.mubr.f32.mxu0 %v351_v54 }
  0x72   : > { %2260 = vmatmul.mubr.f32.gmra.mrb[10].mxu0 %v351_v54  ;;  %v569_v54 = vld [vmem:[%s3942_s3 + $0x18] sm:$0xff] }
  0x73   : > { %2261 = vmatprep.mubr.f32.mxu0 %v352_v55 }
  0x76   : > { %2262 = vmatmul.mubr.f32.gmra.mrb[12].mxu0 %v352_v55  ;;  %v570_v55 = vld [vmem:[%s3942_s3 + $0x20] sm:$0xff] }
  0x77   : > { %2263 = vmatprep.mubr.f32.mxu0 %v353_v56 }
  0x7a   : > { %2264 = vmatmul.mubr.f32.gmra.mrb[14].mxu0 %v353_v56  ;;  %v571_v56 = vld [vmem:[%s3942_s3 + $0x28] sm:$0xff] }
  0x7b   : > { %2265 = vmatprep.mubr.f32.mxu0 %v354_v57 }
  0x7e   : > { %2266 = vmatmul.mubr.f32.gmra.mrb[16].mxu0 %v354_v57  ;;  %v572_v57 = vld [vmem:[%s3942_s3 + $0x30] sm:$0xff] }
  0x7f   : > { %2267 = vmatprep.mubr.f32.mxu0 %v355_v58 }
  0x82   : > { %2268 = vmatmul.mubr.f32.gmra.mrb[18].mxu0 %v355_v58  ;;  %v573_v58 = vld [vmem:[%s3942_s3 + $0x38] sm:$0xff] }
  0x83   : > { %2269 = vmatprep.mubr.f32.mxu0 %v356_v59 }
  0x86   : > { %2270 = vmatmul.mubr.f32.gmra.mrb[20].mxu0 %v356_v59  ;;  %v574_v59 = vld [vmem:[%s3942_s3 + $0x40] sm:$0xff] }
  0xa9   : > { %v587_v62 = vpop.permute.xlu0 %586 }
  0xad   : > { %v592_v4 = vpop.permute.xlu0 %591 }
 0x131   : > { %v2797_v7 = vpop.f32.mrb[0].mxu0 }
 0x132   : > { %v2799_v8 = vpop.f32.mrb[1].mxu0 }
 0x135   : > { %v2801_v9 = vpop.f32.mrb[2].mxu0 }
 0x136   : > { %v2803_v10 = vpop.f32.mrb[3].mxu0 }
 0x139   : > { %v2805_v11 = vpop.f32.mrb[4].mxu0 }
 0x13a   : > { %v2807_v12 = vpop.f32.mrb[5].mxu0 }
 0x13d   : > { %v2809_v13 = vpop.f32.mrb[6].mxu0 }
 0x13e   : > { %v2811_v14 = vpop.f32.mrb[7].mxu0 }
 0x141   : > { %v2813_v15 = vpop.f32.mrb[8].mxu0 }
 0x142   : > { %v2815_v16 = vpop.f32.mrb[9].mxu0 }
 0x145   : > { %v2817_v17 = vpop.f32.mrb[10].mxu0 }
 0x146   : > { %v2819_v18 = vpop.f32.mrb[11].mxu0 }
 0x149   : > { %v2821_v19 = vpop.f32.mrb[12].mxu0 }
 0x14a   : > { %v2823_v20 = vpop.f32.mrb[13].mxu0 }
 0x14d   : > { %v2825_v21 = vpop.f32.mrb[14].mxu0 }
 0x14e   : > { %v2827_v22 = vpop.f32.mrb[15].mxu0 }
 0x151   : > { %v2829_v23 = vpop.f32.mrb[16].mxu0 }
 0x152   : > { %v2831_v24 = vpop.f32.mrb[17].mxu0 }
 0x155   : > { %v509_v25 = vpop.f32.mrb[18].mxu0 }
 0x156   : > { %v2132_v26 = vmul.f32 -1.442695, %v509_v25  ;;  %v511_v27 = vpop.f32.mrb[19].mxu0 }
 0x157   : > { %v2133_v28 = vmul.f32 -1.442695, %v511_v27 }
 0x158   : > { %2552 = vpow2.f32 %v2132_v26 }
 0x159   : > { %2554 = vpow2.f32 %v2133_v28  ;;  %v515_v29 = vpop.f32.mrb[20].mxu0 }
 0x15a   : > { %v2134_v30 = vmul.f32 -1.442695, %v515_v29  ;;  %v517_v31 = vpop.f32.mrb[21].mxu0 }
 0x15b   : > { %v2135_v32 = vmul.f32 -1.442695, %v517_v31 }
 0x15c   : > { %2556 = vpow2.f32 %v2134_v30 }
 0x15d   : > { %2558 = vpow2.f32 %v2135_v32 }
 0x162   : > { %v2553_v33 = vpop.eup %2552 }
 0x163   : > { %v2555_v34 = vpop.eup %2554  ;;  %v550_v35 = vadd.f32 1.0, %v2553_v33 }
 0x164   : > { %v551_v36 = vadd.f32 1.0, %v2555_v34 }
 0x165   : > { %2560 = vrcp.f32 %v550_v35 }
 0x166   : > { %v2557_v37 = vpop.eup %2556  ;;  %2562 = vrcp.f32 %v551_v36 }
 0x167   : > { %v2559_v38 = vpop.eup %2558  ;;  %v552_v39 = vadd.f32 1.0, %v2557_v37 }
 0x168   : > { %v553_v40 = vadd.f32 1.0, %v2559_v38 }
 0x169   : > { %2564 = vrcp.f32 %v552_v39 }
 0x16a   : > { %2566 = vrcp.f32 %v553_v40 }
 0x16f   : > { %v2561_v41 = vpop.eup %2560 }
 0x170   : > { %v2563_v42 = vpop.eup %2562  ;;  %v562_v45 = vmul.f32 %v2561_v41, %v509_v25 }
 0x171   : > { %v563_v47 = vmul.f32 %v2563_v42, %v511_v27 }
 0x173   : > { %v2565_v43 = vpop.eup %2564 }
 0x174   : > { %v2567_v44 = vpop.eup %2566  ;;  %v564_v46 = vmul.f32 %v2565_v43, %v515_v29  ;;  %v597_v29 = vpop.permute.xlu1 %596 }
 0x175   : > { %v565_v48 = vmul.f32 %v2567_v44, %v517_v31 }
 0x176   : > { %v2316_v49 = vpack.c.bf16 %v564_v46, %v562_v45 }
 0x177   : > { %v2314_v50 = vpack.c.bf16 %v565_v48, %v563_v47 }
 0x178   : > { %v602_v47 = vpop.permute.xlu1 %601 }
 0x179   : > { %2315 = vmatprep.subr.bf16.mxu1 %v2314_v50 }
 0x17a   : > { %2317 = vmatpush1.bf16.msra.mxu1 %v2316_v49 }
 0x17d   : > { %2136 = vmatmul.mubr.msk.f32.vlgmr.msra.gmra.mrb[0].mxu1 %vm629_vm0, %v566_v51 }
 0x17e   : > { %727 = vmatprep.mubr.f32.mxu1 %v3947_v60 }
 0x181   : > { %2137 = vmatmul.mubr.msk.f32.gmra.mrb[2].mxu1 %vm629_vm0, %v567_v52 }
 0x182   : > { %733 = vmatprep.mubr.f32.mxu1 %v3947_v60 }
 0x185   : > { %2138 = vmatmul.mubr.msk.f32.gmra.mrb[4].mxu1 %vm629_vm0, %v568_v53 }
 0x186   : > { %739 = vmatprep.mubr.f32.mxu1 %v3947_v60 }
 0x189   : > { %2139 = vmatmul.mubr.msk.f32.gmra.mrb[6].mxu1 %vm629_vm0, %v569_v54 }
 0x18a   : > { %745 = vmatprep.mubr.f32.mxu1 %v3947_v60 }
 0x18d   : > { %2140 = vmatmul.mubr.msk.f32.gmra.mrb[8].mxu1 %vm629_vm0, %v570_v55 }
 0x18e   : > { %751 = vmatprep.mubr.f32.mxu1 %v3947_v60 }
 0x191   : > { %2141 = vmatmul.mubr.msk.f32.gmra.mrb[10].mxu1 %vm629_vm0, %v571_v56 }
 0x192   : > { %757 = vmatprep.mubr.f32.mxu1 %v3947_v60 }
 0x195   : > { %2142 = vmatmul.mubr.msk.f32.gmra.mrb[12].mxu1 %vm629_vm0, %v572_v57 }
 0x196   : > { %763 = vmatprep.mubr.f32.mxu1 %v3947_v60 }
 0x199   : > { %2143 = vmatmul.mubr.msk.f32.gmra.mrb[14].mxu1 %vm629_vm0, %v573_v58 }
 0x19a   : > { %769 = vmatprep.mubr.f32.mxu1 %v3947_v60 }
 0x19d   : > { %2144 = vmatmul.mubr.msk.f32.gmra.mrb[16].mxu1 %vm629_vm0, %v574_v59 }
 0x19e   : > { %1579 = vmatprep.mubr.f32.mxu1 %v1353_v61 }
 0x250   : > { %v723_v63 = vpop.f32.mrb[0].mxu1 }
 0x251   : > { %v724_v0 = vadd.f32 %v723_v63, %v587_v62  ;;  %v725_v1 = vpop.f32.mrb[1].mxu1 }
 0x252   : > { %v726_v2 = vadd.f32 %v725_v1, %v587_v62 }
 0x253   : > { %v798_v3 = vmul.f32 %v724_v0, %v2797_v7 }
 0x254   : > { %v799_v5 = vmul.f32 %v726_v2, %v2799_v8  ;;  %v729_v6 = vpop.f32.mrb[2].mxu1 }
 0x255   : > { %v800_v25 = vmul.f32 %v798_v3, %v2797_v7  ;;  %v730_v26 = vadd.f32 %v729_v6, %v592_v4  ;;  %v731_v27 = vpop.f32.mrb[3].mxu1 }
 0x256   : > { %v801_v28 = vmul.f32 %v799_v5, %v2799_v8  ;;  %v732_v30 = vadd.f32 %v731_v27, %v592_v4 }
 0x257   : > { %v808_v31 = vmul.f32 %v730_v26, %v2797_v7  ;;  %v607_v26 = vpop.permute.xlu0 %606 }
 0x258   : > { %v809_v32 = vmul.f32 %v732_v30, %v2799_v8  ;;  %v735_v33 = vpop.f32.mrb[4].mxu1 }
 0x259   : > { %v736_v34 = vadd.f32 %v735_v33, %v597_v29  ;;  %v737_v35 = vpop.f32.mrb[5].mxu1  ;;  %v812_v36 = vmul.f32 %v808_v31, %v2813_v15  ;;  %v818_v37 = vmul.f32 %v808_v31, %v2817_v17  ;;  %v824_v38 = vmul.f32 %v808_v31, %v2821_v19 }
 0x25a   : > { %v738_v39 = vadd.f32 %v737_v35, %v597_v29  ;;  %v813_v40 = vmul.f32 %v809_v32, %v2815_v16  ;;  %v819_v41 = vmul.f32 %v809_v32, %v2819_v18  ;;  %v825_v42 = vmul.f32 %v809_v32, %v2823_v20 }
 0x25b   : > { %v844_v43 = vmul.f32 %v736_v34, %v2801_v9  ;;  %v852_v44 = vmul.f32 %v736_v34, %v2805_v11  ;;  %v860_v45 = vmul.f32 %v736_v34, %v2809_v13  ;;  %v2320_v46 = vpack.c.bf16 %v812_v36, %v800_v25 }
 0x25c   : > { %v845_v48 = vmul.f32 %v738_v39, %v2803_v10  ;;  %v853_v49 = vmul.f32 %v738_v39, %v2807_v12  ;;  %v861_v50 = vmul.f32 %v738_v39, %v2811_v14  ;;  %v741_v51 = vpop.f32.mrb[6].mxu1  ;;  %v2318_v52 = vpack.c.bf16 %v813_v40, %v801_v28 }
 0x25d   : > { %v2899_v53 = vmul.f32 %v844_v43, %v2801_v9  ;;  %v2902_v54 = vmul.f32 %v852_v44, %v2805_v11  ;;  %v2905_v55 = vmul.f32 %v860_v45, %v2809_v13  ;;  %v742_v56 = vadd.f32 %v741_v51, %v602_v47  ;;  %v743_v57 = vpop.f32.mrb[7].mxu1 }
 0x25e   : > { %v744_v58 = vadd.f32 %v743_v57, %v602_v47  ;;  %2319 = vmatprep.subr.bf16.mxu1 %v2318_v52  ;;  %v2322_v59 = vpack.c.bf16 %v825_v42, %v819_v41  ;;  %v2324_v61 = vpack.c.bf16 %v824_v38, %v818_v37  ;;  %v831_v62 = vmul.f32 %v809_v32, %v2827_v22  ;;  %v612_v41 = vpop.permute.xlu1 %611 }
 0x25f   : > { %v870_v63 = vmul.f32 %v742_v56, %v2801_v9  ;;  %v886_v0 = vmul.f32 %v742_v56, %v2805_v11  ;;  %v902_v1 = vmul.f32 %v742_v56, %v2809_v13  ;;  %2321 = vmatpush1.bf16.msra.mxu1 %v2320_v46  ;;  %v837_v2 = vmul.f32 %v809_v32, %v2831_v24 }
 0x260   : > { %v871_v3 = vmul.f32 %v744_v58, %v2803_v10  ;;  %v887_v4 = vmul.f32 %v744_v58, %v2807_v12  ;;  %v903_v5 = vmul.f32 %v744_v58, %v2811_v14  ;;  %v747_v6 = vpop.f32.mrb[8].mxu1  ;;  %2323 = vmatprep.subr.bf16.mxu1 %v2322_v59  ;;  %v830_v25 = vmul.f32 %v808_v31, %v2825_v21 }
 0x261   : > { %v2917_v27 = vmul.f32 %v870_v63, %v2805_v11  ;;  %v2920_v28 = vmul.f32 %v870_v63, %v2809_v13  ;;  %v2923_v29 = vmul.f32 %v886_v0, %v2801_v9  ;;  %v2926_v30 = vmul.f32 %v886_v0, %v2809_v13  ;;  %v749_v32 = vpop.f32.mrb[9].mxu1  ;;  %v617_v0 = vpop.permute.xlu0 %616 }
 0x262   : > { %v2929_v33 = vmul.f32 %v902_v1, %v2801_v9  ;;  %v2932_v34 = vmul.f32 %v902_v1, %v2805_v11  ;;  %v748_v35 = vadd.f32 %v747_v6, %v607_v26  ;;  %v750_v36 = vadd.f32 %v749_v32, %v607_v26 }
 0x263   : > { %2325 = vmatpush1.bf16.msra.mxu1 %v2324_v61  ;;  %v2326_v37 = vpack.c.bf16 %v837_v2, %v831_v62  ;;  %v836_v38 = vmul.f32 %v808_v31, %v2829_v23  ;;  %v847_v39 = vmul.f32 %v845_v48, %v2803_v10  ;;  %v855_v40 = vmul.f32 %v853_v49, %v2807_v12 }
 0x264   : > { %v920_v42 = vmul.f32 %v748_v35, %v2801_v9  ;;  %v2939_v43 = vmul.f32 %v748_v35, %v2805_v11  ;;  %v2942_v44 = vmul.f32 %v748_v35, %v2809_v13  ;;  %v921_v45 = vmul.f32 %v750_v36, %v2803_v10  ;;  %v753_v46 = vpop.f32.mrb[10].mxu1 }
 0x265   : > { %v941_v47 = vmul.f32 %v750_v36, %v2807_v12  ;;  %v2947_v31 = vmul.f32 %v750_v36, %v2811_v14  ;;  %v2949_v48 = vadd.f32 %v753_v46, %v612_v41  ;;  %2327 = vmatprep.subr.bf16.mxu1 %v2326_v37  ;;  %v755_v49 = vpop.f32.mrb[11].mxu1  ;;  %v2328_v51 = vpack.c.bf16 %v836_v38, %v830_v25  ;;  %v622_v37 = vpop.permute.xlu1 %621 }
 0x266   : > { %v2951_v52 = vadd.f32 %v755_v49, %v612_v41  ;;  %v2330_v56 = vpack.c.bf16 %v855_v40, %v847_v39  ;;  %v2332_v57 = vpack.c.bf16 %v2902_v54, %v2899_v53  ;;  %v863_v58 = vmul.f32 %v861_v50, %v2811_v14 }
 0x267   : > { %2329 = vmatpush1.bf16.msra.mxu1 %v2328_v51  ;;  %v875_v59 = vmul.f32 %v871_v3, %v2807_v12  ;;  %v2336_v61 = vpack.c.bf16 %v2917_v27, %v2905_v55  ;;  %v881_v62 = vmul.f32 %v871_v3, %v2811_v14  ;;  %v891_v63 = vmul.f32 %v887_v4, %v2803_v10 }
 0x268   : > { %v759_v1 = vpop.f32.mrb[12].mxu1  ;;  %2331 = vmatprep.subr.bf16.mxu1 %v2330_v56  ;;  %v2340_v2 = vpack.c.bf16 %v2923_v29, %v2920_v28  ;;  %v2964_v53 = vmul.f32 %v887_v4, %v2811_v14  ;;  %v907_v50 = vmul.f32 %v903_v5, %v2803_v10  ;;  %v2344_v54 = vpack.c.bf16 %v2929_v33, %v2926_v30 }
 0x269   : > { %v2969_v6 = vadd.f32 %v759_v1, %v617_v0  ;;  %v761_v55 = vpop.f32.mrb[13].mxu1  ;;  %v2334_v3 = vpack.c.bf16 %v875_v59, %v863_v58  ;;  %v2338_v25 = vpack.c.bf16 %v891_v63, %v881_v62  ;;  %v2972_v26 = vmul.f32 %v903_v5, %v2807_v12 }
 0x26a   : > { %v2974_v27 = vadd.f32 %v761_v55, %v617_v0  ;;  %v2342_v28 = vpack.c.bf16 %v907_v50, %v2964_v53  ;;  %v2978_v4 = vmul.f32 %v921_v45, %v2803_v10  ;;  %v2981_v29 = vmul.f32 %v920_v42, %v2801_v9  ;;  %v627_v50 = vpop.permute.xlu0 %626 }
 0x26b   : > { %2333 = vmatpush1.bf16.msra.mxu1 %v2332_v57  ;;  %v2984_v32 = vmul.f32 %v921_v45, %v2807_v12  ;;  %v2987_v35 = vmul.f32 %v921_v45, %v2811_v14  ;;  %v2990_v5 = vmul.f32 %v920_v42, %v2805_v11  ;;  %v2993_v36 = vmul.f32 %v920_v42, %v2809_v13 }
 0x26c   : > { %v765_v38 = vpop.f32.mrb[14].mxu1  ;;  %2335 = vmatprep.subr.bf16.mxu1 %v2334_v3  ;;  %v2346_v39 = vpack.c.bf16 %v2978_v4, %v2972_v26  ;;  %v3000_v41 = vmul.f32 %v941_v47, %v2803_v10  ;;  %v3003_v45 = vmul.f32 %v941_v47, %v2807_v12  ;;  %v3013_v56 = vmul.f32 %v2939_v43, %v2801_v9 }
 0x26d   : > { %v3005_v46 = vadd.f32 %v765_v38, %v622_v37  ;;  %v767_v49 = vpop.f32.mrb[15].mxu1  ;;  %v3021_v59 = vmul.f32 %v2939_v43, %v2805_v11  ;;  %v3024_v62 = vmul.f32 %v941_v47, %v2811_v14  ;;  %v3054_v4 = vmul.f32 %v2947_v31, %v2803_v10 }
 0x26e   : > { %v3015_v57 = vadd.f32 %v767_v49, %v622_v37  ;;  %v3058_v38 = vmul.f32 %v2939_v43, %v2809_v13  ;;  %v3062_v49 = vmul.f32 %v2942_v44, %v2801_v9  ;;  %v3072_v10 = vmul.f32 %v2947_v31, %v2811_v14 }
 0x26f   : > { %v3028_v63 = vmul.f32 %v3005_v46, %v2813_v15  ;;  %v3032_v0 = vmul.f32 %v3005_v46, %v2817_v17  ;;  %v3036_v1 = vmul.f32 %v3005_v46, %v2825_v21  ;;  %v3040_v53 = vmul.f32 %v3005_v46, %v2829_v23  ;;  %2337 = vmatpush1.bf16.msra.mxu1 %v2336_v61 }
 0x270   : > { %v3044_v47 = vmul.f32 %v3015_v57, %v2819_v18  ;;  %v3048_v55 = vmul.f32 %v3015_v57, %v2827_v22  ;;  %v771_v3 = vpop.f32.mrb[16].mxu1  ;;  %2339 = vmatprep.subr.bf16.mxu1 %v2338_v25  ;;  %v3066_v25 = vmul.f32 %v2947_v31, %v2807_v12  ;;  %v3076_v43 = vmul.f32 %v2942_v44, %v2805_v11 }
 0x271   : > { %v772_v37 = vadd.f32 %v771_v3, %v627_v50  ;;  %v773_v61 = vpop.f32.mrb[17].mxu1  ;;  %v3114_v51 = vmul.f32 %v2942_v44, %v2809_v13  ;;  %v987_v42 = vmul.f32 %v2951_v52, %v2815_v16  ;;  %v1007_v13 = vmul.f32 %v2951_v52, %v2823_v20 }
 0x272   : > { %v774_v60 = vadd.f32 %v773_v61, %v627_v50  ;;  %v1017_v44 = vmul.f32 %v2951_v52, %v2827_v22 }
 0x273   : > { %v3079_v3 = vmul.f32 %v772_v37, %v2813_v15  ;;  %v3082_v9 = vmul.f32 %v772_v37, %v2817_v17  ;;  %v3085_v12 = vmul.f32 %v772_v37, %v2821_v19  ;;  %v3088_v50 = vmul.f32 %v772_v37, %v2825_v21  ;;  %2341 = vmatpush1.bf16.msra.mxu1 %v2340_v2 }
 0x274   : > { %v3091_v14 = vmul.f32 %v772_v37, %v2829_v23  ;;  %v3094_v31 = vmul.f32 %v774_v60, %v2815_v16  ;;  %v3097_v11 = vmul.f32 %v774_v60, %v2819_v18  ;;  %v3100_v61 = vmul.f32 %v774_v60, %v2823_v20  ;;  %2343 = vmatprep.subr.bf16.mxu1 %v2342_v28 }
 0x275   : > { %3979 = vst [vmem:[#allocation5_spill] sm:$0xff] %v3088_v50  ;;  %v3103_v26 = vmul.f32 %v774_v60, %v2827_v22  ;;  %v3106_v58 = vmul.f32 %v774_v60, %v2831_v24  ;;  %v997_v28 = vmul.f32 %v2951_v52, %v2819_v18  ;;  %v986_v60 = vmul.f32 %v2949_v48, %v2813_v15 }
 0x276   : > { %3980 = vst [vmem:[#allocation6_spill] sm:$0xff] %v3091_v14  ;;  %v996_v37 = vmul.f32 %v2949_v48, %v2817_v17  ;;  %v1006_v2 = vmul.f32 %v2949_v48, %v2821_v19  ;;  %v3136_v14 = vmul.f32 %v987_v42, %v2799_v8  ;;  %v1026_v42 = vmul.f32 %v2949_v48, %v2829_v23 }
 0x277   : > { %3981 = vst [vmem:[#allocation7_spill] sm:$0xff] %v3103_v26  ;;  %3982 = vst [vmem:[#allocation8_spill] sm:$0xff] %v3106_v58  ;;  %2345 = vmatpush1.bf16.msra.mxu1 %v2344_v54  ;;  %v3139_v30 = vmul.f32 %v997_v28, %v2799_v8  ;;  %v3142_v33 = vmul.f32 %v986_v60, %v2797_v7  ;;  %v3148_v58 = vmul.f32 %v1007_v13, %v2799_v8 }
 0x278   : > { %2347 = vmatprep.subr.bf16.mxu1 %v2346_v39  ;;  %v3145_v54 = vmul.f32 %v996_v37, %v2797_v7  ;;  %v3151_v39 = vmul.f32 %v1017_v44, %v2799_v8  ;;  %v3154_v40 = vmul.f32 %v1006_v2, %v2797_v7  ;;  %v1016_v28 = vmul.f32 %v2949_v48, %v2825_v21 }
 0x279   : > { %v1027_v60 = vmul.f32 %v2951_v52, %v2831_v24  ;;  %v1039_v37 = vmul.f32 %v2974_v27, %v2815_v16  ;;  %v3983_v13 = vpack.c.bf16 %v2981_v29, %v2932_v34  ;;  %v1038_v50 = vmul.f32 %v2969_v6, %v2813_v15 }
 0x27a   : > { %v3984_v52 = vpack.c.bf16 %v2987_v35, %v2984_v32  ;;  %v3179_v26 = vmul.f32 %v1016_v28, %v2797_v7  ;;  %v3190_v48 = vmul.f32 %v1026_v42, %v2797_v7  ;;  %v1055_v32 = vmul.f32 %v2974_v27, %v2823_v20 }
 0x27b   : > { %2349 = vmatpush1.bf16.msra.mxu1 %v3983_v13  ;;  %v3182_v34 = vmul.f32 %v1027_v60, %v2799_v8  ;;  %v3185_v29 = vmul.f32 %v1039_v37, %v2815_v16  ;;  %v1047_v13 = vmul.f32 %v2974_v27, %v2819_v18  ;;  %v3193_v44 = vmul.f32 %v1038_v50, %v2813_v15 }
 0x27c   : > { %2351 = vmatprep.subr.bf16.mxu1 %v3984_v52  ;;  %v1046_v35 = vmul.f32 %v2969_v6, %v2817_v17  ;;  %v1054_v7 = vmul.f32 %v2969_v6, %v2821_v19  ;;  %v3985_v50 = vpack.c.bf16 %v2993_v36, %v2990_v5  ;;  %v3214_v37 = vmul.f32 %v1055_v32, %v2823_v20 }
 0x27d   : > { %v3204_v60 = vmul.f32 %v1047_v13, %v2819_v18  ;;  %v1063_v13 = vmul.f32 %v2974_v27, %v2827_v22  ;;  %v3986_v28 = vpack.c.bf16 %v3003_v45, %v3000_v41  ;;  %v1071_v5 = vmul.f32 %v2974_v27, %v2831_v24 }
 0x27e   : > { %v3217_v52 = vmul.f32 %v1046_v35, %v2817_v17  ;;  %v3225_v8 = vmul.f32 %v1054_v7, %v2821_v19  ;;  %v1062_v36 = vmul.f32 %v2969_v6, %v2825_v21  ;;  %v1070_v32 = vmul.f32 %v2969_v6, %v2829_v23 }
 0x27f   : > { %2353 = vmatpush1.bf16.msra.mxu1 %v3985_v50  ;;  %v3236_v50 = vmul.f32 %v1063_v13, %v2827_v22  ;;  %v1081_v41 = vmul.f32 %v3015_v57, %v2815_v16  ;;  %v3242_v45 = vmul.f32 %v3028_v63, %v2817_v17  ;;  %v3988_v13 = vpack.c.bf16 %v3021_v59, %v3013_v56 }
 0x280   : > { %2355 = vmatprep.subr.bf16.mxu1 %v3986_v28  ;;  %v3247_v28 = vmul.f32 %v1071_v5, %v2831_v24  ;;  %v3250_v6 = vmul.f32 %v1062_v36, %v2825_v21  ;;  %v3253_v7 = vmul.f32 %v1070_v32, %v2829_v23  ;;  %v3266_v5 = vmul.f32 %v3028_v63, %v2825_v21 }
 0x281   : > { %3987 = vst [vmem:[#allocation9_spill] sm:$0xff] %v3242_v45  ;;  %v3259_v35 = vmul.f32 %v1081_v41, %v2819_v18  ;;  %v3262_v42 = vmul.f32 %v1081_v41, %v2827_v22  ;;  %v3269_v36 = vmul.f32 %v1081_v41, %v2831_v24  ;;  %v3990_v32 = vpack.c.bf16 %v3054_v4, %v3024_v62 }
 0x282   : > { %v3284_v27 = vmul.f32 %v3028_v63, %v2829_v23  ;;  %v3292_v4 = vmul.f32 %v3032_v0, %v2813_v15  ;;  %v3302_v63 = vmul.f32 %v3044_v47, %v2827_v22  ;;  %v3306_v41 = vmul.f32 %v3032_v0, %v2821_v19 }
 0x283   : > { %2357 = vmatpush1.bf16.msra.mxu1 %v3988_v13  ;;  %3989 = vst [vmem:[#allocation10_spill] sm:$0xff] %v3269_v36  ;;  %v3280_v13 = vmul.f32 %v3044_v47, %v2815_v16  ;;  %v3310_v62 = vmul.f32 %v3032_v0, %v2825_v21  ;;  %v3996_v56 = vpack.c.bf16 %v3062_v49, %v3058_v38 }
 0x284   : > { %2359 = vmatprep.subr.bf16.mxu1 %v3990_v32  ;;  %v3296_v32 = vmul.f32 %v3044_v47, %v2823_v20  ;;  %3993 = vst [vmem:[#allocation13_spill] sm:$0xff] %v3302_v63  ;;  %3994 = vst [vmem:[#allocation14_spill] sm:$0xff] %v3306_v41  ;;  %v3319_v59 = vmul.f32 %v3044_v47, %v2831_v24  ;;  %v1131_v36 = vmul.f32 %v3015_v57, %v2823_v20 }
 0x285   : > { %3991 = vst [vmem:[#allocation11_spill] sm:$0xff] %v3280_v13  ;;  %3995 = vst [vmem:[#allocation15_spill] sm:$0xff] %v3310_v62  ;;  %v3325_v13 = vmul.f32 %v3032_v0, %v2829_v23  ;;  %v3997_v45 = vpack.c.bf16 %v3072_v10, %v3066_v25  ;;  %v1130_v47 = vmul.f32 %v3005_v46, %v2821_v19 }
 0x286   : > { %3992 = vst [vmem:[#allocation12_spill] sm:$0xff] %v3296_v32  ;;  %v3341_v0 = vmul.f32 %v1131_v36, %v2819_v18  ;;  %v3344_v2 = vmul.f32 %v1131_v36, %v2827_v22  ;;  %v3348_v25 = vmul.f32 %v3036_v1, %v2813_v15  ;;  %v3352_v10 = vmul.f32 %v3048_v55, %v2819_v18 }
 0x287   : > { %2361 = vmatpush1.bf16.msra.mxu1 %v3996_v56  ;;  %v3338_v56 = vmul.f32 %v3048_v55, %v2815_v16  ;;  %v3355_v46 = vmul.f32 %v1130_v47, %v2817_v17  ;;  %v3362_v49 = vmul.f32 %v3048_v55, %v2823_v20  ;;  %v3366_v36 = vmul.f32 %v3036_v1, %v2817_v17 }
 0x288   : > { %2363 = vmatprep.subr.bf16.mxu1 %v3997_v45  ;;  %v3358_v45 = vmul.f32 %v1130_v47, %v2825_v21  ;;  %v3999_v38 = vpack.c.bf16 %v3114_v51, %v3076_v43  ;;  %v3377_v47 = vmul.f32 %v3036_v1, %v2821_v19  ;;  %v3381_v32 = vmul.f32 %v3048_v55, %v2831_v24 }
 0x289   : > { %3998 = vst [vmem:[#allocation16_spill] sm:$0xff] %v3366_v36  ;;  %v4000_v63 = vpack.c.bf16 %v3139_v30, %v3136_v14  ;;  %v1175_v62 = vmul.f32 %v3015_v57, %v2831_v24  ;;  %v3398_v41 = vmul.f32 %v3036_v1, %v2829_v23  ;;  %v3402_v14 = vmul.f32 %v3040_v53, %v2813_v15 }
 0x28a   : > { %v3406_v30 = vmul.f32 %v3040_v53, %v2817_v17  ;;  %v3419_v1 = vmul.f32 %v3040_v53, %v2825_v21  ;;  %v3428_v51 = vmul.f32 %v3094_v31, %v2815_v16  ;;  %v3432_v36 = vmul.f32 %v3094_v31, %v2819_v18 }
 0x28b   : > { %2365 = vmatpush1.bf16.msra.mxu1 %v3999_v38  ;;  %4001 = vst [vmem:[#allocation17_spill] sm:$0xff] %v3398_v41  ;;  %v3412_v57 = vmul.f32 %v1175_v62, %v2819_v18  ;;  %v3415_v55 = vmul.f32 %v1175_v62, %v2827_v22  ;;  %v4002_v38 = vpack.c.bf16 %v3145_v54, %v3142_v33 }
 0x28c   : > { %2367 = vmatprep.subr.bf16.mxu1 %v4000_v63  ;;  %v3409_v63 = vmul.f32 %v1175_v62, %v2815_v16  ;;  %4003 = vst [vmem:[#allocation18_spill] sm:$0xff] %v3428_v51  ;;  %v3436_v62 = vmul.f32 %v3079_v3, %v2813_v15  ;;  %v4005_v53 = vpack.c.bf16 %v3151_v39, %v3148_v58 }
 0x28d   : > { %v3449_v43 = vmul.f32 %v3079_v3, %v2817_v17  ;;  %v3455_v58 = vmul.f32 %v3094_v31, %v2823_v20  ;;  %v3459_v39 = vmul.f32 %v3094_v31, %v2827_v22  ;;  %v3469_v54 = vmul.f32 %v3079_v3, %v2825_v21 }
 0x28e   : > { %4004 = vst [vmem:[#allocation19_spill] sm:$0xff] %v3436_v62  ;;  %v3473_v41 = vmul.f32 %v3097_v11, %v2815_v16  ;;  %v3477_v33 = vmul.f32 %v3097_v11, %v2819_v18  ;;  %v4008_v31 = vpack.c.bf16 %v3179_v26, %v3154_v40  ;;  %v3494_v62 = vmul.f32 %v3097_v11, %v2823_v20 }
 0x28f   : > { %2369 = vmatpush1.bf16.msra.mxu1 %v4002_v38  ;;  %4006 = vst [vmem:[#allocation20_spill] sm:$0xff] %v3449_v43  ;;  %4007 = vst [vmem:[#allocation21_spill] sm:$0xff] %v3455_v58  ;;  %v3486_v38 = vmul.f32 %v3082_v9, %v2813_v15  ;;  %v4012_v43 = vpack.c.bf16 %v3185_v29, %v3182_v34  ;;  %v3509_v51 = vmul.f32 %v3082_v9, %v2821_v19 }
 0x290   : > { %2371 = vmatprep.subr.bf16.mxu1 %v4005_v53  ;;  %v3463_v53 = vmul.f32 %v3079_v3, %v2821_v19  ;;  %v3490_v3 = vmul.f32 %v3082_v9, %v2817_v17  ;;  %4011 = vst [vmem:[#allocation24_spill] sm:$0xff] %v3494_v62  ;;  %v3515_v34 = vmul.f32 %v3082_v9, %v2825_v21 }
 0x291   : > { %4009 = vst [vmem:[#allocation22_spill] sm:$0xff] %v3486_v38  ;;  %v3519_v29 = vmul.f32 %v3097_v11, %v2831_v24  ;;  %v3529_v40 = vmul.f32 %v3082_v9, %v2829_v23  ;;  %v3533_v58 = vmul.f32 %v3085_v12, %v2813_v15  ;;  %v3537_v38 = vmul.f32 %v3100_v61, %v2819_v18 }
 0x292   : > { %4010 = vst [vmem:[#allocation23_spill] sm:$0xff] %v3490_v3  ;;  %v3548_v9 = vmul.f32 %v3100_v61, %v2823_v20  ;;  %v3552_v62 = vmul.f32 %v3085_v12, %v2817_v17  ;;  %v3569_v26 = vmul.f32 %v3100_v61, %v2831_v24 }
 0x293   : > { %2373 = vmatpush1.bf16.msra.mxu1 %v4008_v31  ;;  %v3505_v31 = vmul.f32 %v3097_v11, %v2827_v22  ;;  %4014 = vst [vmem:[#allocation26_spill] sm:$0xff] %v3529_v40  ;;  %4015 = vst [vmem:[#allocation27_spill] sm:$0xff] %v3537_v38  ;;  %v4016_v11 = vpack.c.bf16 %v3193_v44, %v3190_v48  ;;  %v3561_v48 = vmul.f32 %v3085_v12, %v2821_v19  ;;  %v4026_v38 = vld [vmem:[#allocation5_spill] sm:$0xff] }
 0x294   : > { %2375 = vmatprep.subr.bf16.mxu1 %v4012_v43  ;;  %v3523_v43 = vmul.f32 %v3100_v61, %v2815_v16  ;;  %4017 = vst [vmem:[#allocation28_spill] sm:$0xff] %v3548_v9  ;;  %4020 = vst [vmem:[#allocation30_spill] sm:$0xff] %v3569_v26  ;;  %v3595_v9 = vmul.f32 %v4026_v38, %v2813_v15  ;;  %v3627_v40 = vmul.f32 %v4026_v38, %v2821_v19 }
 0x295   : > { %4013 = vst [vmem:[#allocation25_spill] sm:$0xff] %v3505_v31  ;;  %v4018_v31 = vpack.c.bf16 %v3214_v37, %v3204_v60  ;;  %v3575_v60 = vmul.f32 %v3085_v12, %v2825_v21  ;;  %v3579_v37 = vmul.f32 %v3085_v12, %v2829_v23  ;;  %v4027_v12 = vpack.c.bf16 %v3225_v8, %v3217_v52  ;;  %v1358_v52 = vld [vmem:[%s3944_s5 + $0x30] sm:$0xff] }
 0x296   : > { %v4028_v8 = vpack.c.bf16 %v3247_v28, %v3236_v50 }
 0x297   : > { %2377 = vmatpush1.bf16.msra.mxu1 %v4016_v11  ;;  %v3565_v11 = vmul.f32 %v3100_v61, %v2827_v22  ;;  %4021 = vst [vmem:[#allocation31_spill] sm:$0xff] %v3575_v60  ;;  %4022 = vst [vmem:[#allocation32_spill] sm:$0xff] %v3579_v37  ;;  %v3607_v61 = vmul.f32 %v4026_v38, %v2817_v17  ;;  %v3631_v60 = vmul.f32 %v4026_v38, %v2825_v21 }
 0x298   : > { %2379 = vmatprep.subr.bf16.mxu1 %v4018_v31  ;;  %v4023_v31 = vld [vmem:[#allocation7_spill] sm:$0xff] }
 0x299   : > { %4019 = vst [vmem:[#allocation29_spill] sm:$0xff] %v3565_v11  ;;  %v3583_v44 = vmul.f32 %v4023_v31, %v2815_v16  ;;  %v3591_v3 = vmul.f32 %v4023_v31, %v2819_v18  ;;  %v1352_v16 = vld [vmem:[%s3944_s5] sm:$0xff]  ;;  %v3611_v11 = vmul.f32 %v4023_v31, %v2823_v20  ;;  %v3615_v15 = vmul.f32 %v4023_v31, %v2827_v22 }
 0x29a   : > { %v3635_v37 = vmul.f32 %v4023_v31, %v2831_v24  ;;  %v4030_v31 = vld [vmem:[#allocation6_spill] sm:$0xff] }
 0x29b   : > { %4024 = vst [vmem:[#allocation7_spill] sm:$0xff] %v3583_v44  ;;  %4025 = vst [vmem:[#allocation33_spill] sm:$0xff] %v3591_v3  ;;  %2381 = vmatpush1.bf16.msra.mxu1 %v4027_v12  ;;  %v2450_v28 = vpack.c.bf16 %v3615_v15, %v3611_v11  ;;  %v3647_v44 = vmul.f32 %v4026_v38, %v2829_v23  ;;  %v3653_v26 = vmul.f32 %v4030_v31, %v2817_v17  ;;  %v4036_v3 = vld [vmem:[#allocation10_spill] sm:$0xff] }
 0x29c   : > { %2383 = vmatprep.subr.bf16.mxu1 %v4028_v8  ;;  %v4029_v8 = vld [vmem:[#allocation8_spill] sm:$0xff]  ;;  %v4031_v38 = vpack.c.bf16 %v3253_v7, %v3250_v6  ;;  %v4032_v6 = vpack.c.bf16 %v3262_v42, %v3259_v35  ;;  %v1746_v35 = vlaneseq }
 0x29d   : > { %v3643_v12 = vmul.f32 %v4029_v8, %v2819_v18  ;;  %v3657_v50 = vmul.f32 %v4029_v8, %v2823_v20  ;;  %v3661_v18 = vmul.f32 %v4029_v8, %v2827_v22  ;;  %v3673_v20 = vmul.f32 %v4030_v31, %v2821_v19  ;;  %v1355_v7 = vld [vmem:[%s3944_s5 + $0x18] sm:$0xff] }
 0x29e   : > { %1580 = vmatmul.mubr.f32.vlgmr.msra.gmra.mrb[18].mxu1 %v1352_v16  ;;  %v1357_v16 = vld [vmem:[%s3944_s5 + $0x28] sm:$0xff]  ;;  %v3677_v22 = vmul.f32 %v4030_v31, %v2825_v21  ;;  %v3691_v19 = vmul.f32 %v4029_v8, %v2831_v24  ;;  %v3695_v21 = vmul.f32 %v4030_v31, %v2829_v23  ;;  %v1763_v23 = vld [vmem:[%s331_s19] sm:$0x3] }
 0x29f   : > { %2385 = vmatpush1.bf16.msra.mxu1 %v4031_v38  ;;  %1585 = vmatprep.mubr.f32.mxu1 %v1358_v52  ;;  %v3702_v52 = vshrl.u32 %v1746_v35, 7  ;;  %v4035_v38 = vld [vmem:[#allocation11_spill] sm:$0xff]  ;;  %v4039_v35 = vld [vmem:[#allocation13_spill] sm:$0xff]  ;;  %v4094_v11 = vpack.c.bf16 %v3661_v18, %v3657_v50 }
 0x2a0   : > { %2387 = vmatprep.subr.bf16.mxu1 %v4032_v6  ;;  %v2460_v42 = vpack.c.bf16 %v3677_v22, %v3673_v20  ;;  %v4033_v6 = vld [vmem:[#allocation9_spill] sm:$0xff]  ;;  %v4037_v24 = vpack.c.bf16 %v4035_v38, %v4036_v3  ;;  %v1869_v20 = vld [vmem:[%s2699_s22 + $0x8] sm:$0xff] }
 0x2a1   : > { %v4034_v17 = vpack.c.bf16 %v3266_v5, %v4033_v6  ;;  %v1748_v8 = vadd.s32 8, %v3702_v52  ;;  %v1766_v31 = vsub.s32 0, %v3702_v52  ;;  %v1749_v5 = vadd.s32 16, %v3702_v52  ;;  %v4040_v6 = vld [vmem:[#allocation12_spill] sm:$0xff] }
 0x2a2   : > { %1586 = vmatmul.mubr.f32.gmra.mrb[20].mxu1 %v1357_v16  ;;  %v1770_v16 = vsub.s32 1, %v3702_v52 }
 0x2a3   : > { %2389 = vmatpush1.bf16.msra.mxu1 %v4034_v17  ;;  %1656 = vmatprep.mubr.f32.mxu1 %v1355_v7  ;;  %v1750_v17 = vadd.s32 24, %v3702_v52  ;;  %v4038_v7 = vpack.c.bf16 %v3292_v4, %v3284_v27  ;;  %v3720_v3 = vrot.slane %v1763_v23, %v1766_v31  ;;  %v4042_v27 = vld [vmem:[#allocation15_spill] sm:$0xff]  ;;  %v4043_v4 = vld [vmem:[#allocation14_spill] sm:$0xff]  ;;  %v2611_v31 = vmov 1.0|1.0  }
 0x2a4   : > { %2391 = vmatprep.subr.bf16.mxu1 %v4037_v24  ;;  %v3722_v38 = vrot.slane %v1763_v23, %v1770_v16  ;;  %v4041_v24 = vpack.c.bf16 %v4039_v35, %v4040_v6  ;;  %v4044_v23 = vpack.c.bf16 %v4042_v27, %v4043_v4  ;;  %v1751_v16 = vadd.s32 32, %v3702_v52  ;;  %v4066_v4 = vld [vmem:[#allocation23_spill] sm:$0xff] }
 0x2a5   : > { %vm1772_vm3 = vcmp.eq.s32.totalorder %v3702_v52, %v3720_v3  ;;  %vm1774_vm4 = vcmp.eq.s32.totalorder %v1748_v8, %v3720_v3  ;;  %vm1776_vm10 = vcmp.eq.s32.totalorder %v1749_v5, %v3720_v3  ;;  %vm1778_vm11 = vcmp.eq.s32.totalorder %v1750_v17, %v3720_v3 }
 0x2a6   : > { %vm1773_vm1 = vcmp.eq.s32.totalorder %v3702_v52, %v3722_v38  ;;  %vm1775_vm2 = vcmp.eq.s32.totalorder %v1748_v8, %v3722_v38  ;;  %vm1777_vm6 = vcmp.eq.s32.totalorder %v1749_v5, %v3722_v38  ;;  %vm1779_vm7 = vcmp.eq.s32.totalorder %v1750_v17, %v3722_v38  ;;  %vm2464_vm8 = vmpackc.low %vm1774_vm4, %vm1772_vm3 }
 0x2a7   : > { %2393 = vmatpush1.bf16.msra.mxu1 %v4038_v7  ;;  %vm2462_vm5 = vmpackc.low %vm1775_vm2, %vm1773_vm1  ;;  %v1752_v7 = vadd.s32 40, %v3702_v52  ;;  %v4045_v8 = vpack.c.bf16 %v3341_v0, %v3319_v59  ;;  %v4046_v35 = vpack.c.bf16 %v3355_v46, %v3325_v13  ;;  %vm1781_vm12 = vcmp.eq.s32.totalorder %v1751_v16, %v3722_v38 }
 0x2a8   : > { %2395 = vmatprep.subr.bf16.mxu1 %v4041_v24  ;;  %2463 = vmatprep.subr.msk.bf16.mxu0 %vm2462_vm5, %v2611_v31  ;;  %vm2466_vm9 = vmpackc.low %vm1779_vm7, %vm1777_vm6  ;;  %v4047_v59 = vpack.c.bf16 %v3338_v56, %v3344_v2  ;;  %v4048_v0 = vpack.c.bf16 %v3348_v25, %v3358_v45  ;;  %v1753_v5 = vadd.s32 48, %v3702_v52  ;;  %v1754_v17 = vadd.s32 56, %v3702_v52  ;;  %v4050_v2 = vld [vmem:[#allocation16_spill] sm:$0xff]  ;;  %v4053_v25 = vld [vmem:[#allocation17_spill] sm:$0xff] }
 0x2a9   : > { %2465 = vmatpush1.bf16.xpose.msk.msra.mxu0 %vm2464_vm8, %v2611_v31  ;;  %vm1783_vm13 = vcmp.eq.s32.totalorder %v1752_v7, %v3722_v38  ;;  %vm2468_vm14 = vmpackc.low %vm1778_vm11, %vm1776_vm10  ;;  %v4049_v13 = vpack.c.bf16 %v3362_v49, %v3352_v10  ;;  %vm1780_vm1 = vcmp.eq.s32.totalorder %v1751_v16, %v3720_v3  ;;  %vm1782_vm2 = vcmp.eq.s32.totalorder %v1752_v7, %v3720_v3 }
 0x2aa   : > { %2467 = vmatprep.subr.msk.bf16.mxu0 %vm2466_vm9, %v2611_v31  ;;  %vm2470_vm15 = vmpackc.low %vm1783_vm13, %vm1781_vm12  ;;  %v4051_v56 = vpack.c.bf16 %v3377_v47, %v4050_v2  ;;  %vm1785_vm3 = vcmp.eq.s32.totalorder %v1753_v5, %v3722_v38  ;;  %vm1787_vm4 = vcmp.eq.s32.totalorder %v1754_v17, %v3722_v38  ;;  %v4052_v49 = vpack.c.bf16 %v3409_v63, %v3381_v32  ;;  %v4059_v63 = vld [vmem:[#allocation20_spill] sm:$0xff] }
 0x2ab   : > { %2397 = vmatpush1.bf16.msra.mxu1 %v4044_v23  ;;  %vm2472_vm5 = vmpackc.low %vm1782_vm2, %vm1780_vm1  ;;  %v4054_v10 = vpack.c.bf16 %v3402_v14, %v4053_v25  ;;  %v1755_v46 = vadd.s32 64, %v3702_v52  ;;  %v1756_v45 = vadd.s32 72, %v3702_v52  ;;  %v4055_v47 = vpack.c.bf16 %v3415_v55, %v3412_v57  ;;  %v4057_v14 = vld [vmem:[#allocation18_spill] sm:$0xff]  ;;  %v4060_v57 = vld [vmem:[#allocation19_spill] sm:$0xff] }
 0x2ac   : > { %2399 = vmatprep.subr.bf16.mxu1 %v4045_v8  ;;  %vm2474_vm6 = vmpackc.low %vm1787_vm4, %vm1785_vm3  ;;  %vm1784_vm7 = vcmp.eq.s32.totalorder %v1753_v5, %v3720_v3  ;;  %vm1786_vm8 = vcmp.eq.s32.totalorder %v1754_v17, %v3720_v3  ;;  %v4056_v32 = vpack.c.bf16 %v3419_v1, %v3406_v30  ;;  %v4058_v55 = vpack.c.bf16 %v3432_v36, %v4057_v14  ;;  %v4062_v30 = vld [vmem:[#allocation21_spill] sm:$0xff]  ;;  %v4067_v23 = vld [vmem:[#allocation22_spill] sm:$0xff] }
 0x2ad   : > { %vm1789_vm9 = vcmp.eq.s32.totalorder %v1755_v46, %v3722_v38  ;;  %vm1791_vm10 = vcmp.eq.s32.totalorder %v1756_v45, %v3722_v38  ;;  %vm2476_vm11 = vmpackc.low %vm1786_vm8, %vm1784_vm7  ;;  %v4061_v6 = vpack.c.bf16 %v4059_v63, %v4060_v57  ;;  %v1757_v24 = vadd.s32 80, %v3702_v52  ;;  %v4083_v2 = vld [vmem:[#allocation32_spill] sm:$0xff]  ;;  %v1354_v25 = vld [vmem:[%s3944_s5 + $0x10] sm:$0xff] }
 0x2ae   : > { %vm2478_vm12 = vmpackc.low %vm1791_vm10, %vm1789_vm9  ;;  %v1758_v27 = vadd.s32 88, %v3702_v52  ;;  %v4063_v1 = vpack.c.bf16 %v3459_v39, %v4062_v30  ;;  %vm1788_vm13 = vcmp.eq.s32.totalorder %v1755_v46, %v3720_v3  ;;  %v4064_v36 = vpack.c.bf16 %v3469_v54, %v3463_v53  ;;  %v4069_v54 = vld [vmem:[#allocation25_spill] sm:$0xff]  ;;  %v4070_v53 = vld [vmem:[#allocation24_spill] sm:$0xff] }
 0x2af   : > { %2401 = vmatpush1.bf16.msra.mxu1 %v4046_v35  ;;  %v4065_v39 = vpack.c.bf16 %v3477_v33, %v3473_v41  ;;  %v4068_v16 = vpack.c.bf16 %v4066_v4, %v4067_v23  ;;  %v1759_v7 = vadd.s32 96, %v3702_v52  ;;  %v1760_v8 = vadd.s32 104, %v3702_v52 }
 0x2b0   : > { %2403 = vmatprep.subr.bf16.mxu1 %v4047_v59  ;;  %vm1795_vm1 = vcmp.eq.s32.totalorder %v1758_v27, %v3722_v38  ;;  %v4071_v35 = vpack.c.bf16 %v4069_v54, %v4070_v53  ;;  %vm1792_vm4 = vcmp.eq.s32.totalorder %v1757_v24, %v3720_v3  ;;  %v4072_v41 = vpack.c.bf16 %v3515_v34, %v3509_v51  ;;  %v4074_v59 = vld [vmem:[#allocation26_spill] sm:$0xff]  ;;  %v4076_v51 = vld [vmem:[#allocation28_spill] sm:$0xff]  ;;  %v4077_v34 = vld [vmem:[#allocation27_spill] sm:$0xff] }
 0x2b1   : > { %2469 = vmatpush1.bf16.xpose.msk.msra.mxu0 %vm2468_vm14, %v2611_v31  ;;  %vm1790_vm14 = vcmp.eq.s32.totalorder %v1756_v45, %v3720_v3  ;;  %vm1799_vm7 = vcmp.eq.s32.totalorder %v1760_v8, %v3722_v38  ;;  %v4073_v33 = vpack.c.bf16 %v3523_v43, %v3519_v29  ;;  %v1761_v5 = vadd.s32 112, %v3702_v52  ;;  %v4080_v29 = vld [vmem:[#allocation30_spill] sm:$0xff]  ;;  %v4081_v43 = vld [vmem:[#allocation29_spill] sm:$0xff]  ;;  %v1359_v45 = vld [vmem:[%s3944_s5 + $0x38] sm:$0xff] }
 0x2b2   : > { %2471 = vmatprep.subr.msk.bf16.mxu0 %vm2470_vm15, %v2611_v31  ;;  %vm1793_vm15 = vcmp.eq.s32.totalorder %v1757_v24, %v3722_v38  ;;  %vm2480_vm2 = vmpackc.low %vm1790_vm14, %vm1788_vm13  ;;  %v1762_v17 = vadd.s32 120, %v3702_v52  ;;  %vm1796_vm10 = vcmp.eq.s32.totalorder %v1759_v7, %v3720_v3  ;;  %v4082_v52 = vpack.c.bf16 %v4080_v29, %v4081_v43 }
 0x2b3   : > { %2405 = vmatpush1.bf16.msra.mxu1 %v4048_v0  ;;  %vm2482_vm3 = vmpackc.low %vm1795_vm1, %vm1793_vm15  ;;  %v4075_v0 = vpack.c.bf16 %v3533_v58, %v4074_v59  ;;  %v4079_v58 = vpack.c.bf16 %v3561_v48, %v3552_v62  ;;  %v4086_v62 = vld [vmem:[#allocation33_spill] sm:$0xff]  ;;  %v4087_v48 = vld [vmem:[#allocation7_spill] sm:$0xff]  ;;  %vm1800_vm1 = vcmp.eq.s32.totalorder %v1761_v5, %v3720_v3  ;;  %v4089_v46 = vpack.c.bf16 %v3607_v61, %v3595_v9 }
 0x2b4   : > { %2407 = vmatprep.subr.bf16.mxu1 %v4049_v13  ;;  %v4078_v13 = vpack.c.bf16 %v4076_v51, %v4077_v34  ;;  %vm1803_vm13 = vcmp.eq.s32.totalorder %v1762_v17, %v3722_v38  ;;  %v4092_v9 = vpack.c.bf16 %v3643_v12, %v3635_v37  ;;  %v4093_v61 = vpack.c.bf16 %v3653_v26, %v3647_v44  ;;  %v1361_v26 = vld [vmem:[%s3944_s5 + $0x48] sm:$0xff]  ;;  %v1868_v12 = vld [vmem:[%s2699_s22] sm:$0xff] }
 0x2b7   : > { %2409 = vmatpush1.bf16.msra.mxu1 %v4051_v56  ;;  %v4084_v56 = vld [vmem:[#allocation31_spill] sm:$0xff] }
 0x2b8   : > { %2411 = vmatprep.subr.bf16.mxu1 %v4052_v49  ;;  %v4085_v49 = vpack.c.bf16 %v4083_v2, %v4084_v56 }
 0x2b9   : > { %2473 = vmatpush1.bf16.xpose.msk.msra.mxu0 %vm2472_vm5, %v2611_v31  ;;  %vm1794_vm5 = vcmp.eq.s32.totalorder %v1758_v27, %v3720_v3 }
 0x2ba   : > { %2475 = vmatprep.subr.msk.bf16.mxu0 %vm2474_vm6, %v2611_v31  ;;  %vm1797_vm6 = vcmp.eq.s32.totalorder %v1759_v7, %v3722_v38  ;;  %vm2484_vm8 = vmpackc.low %vm1794_vm5, %vm1792_vm4  ;;  %vm1508_vm4 = vcmask 588800  }
 0x2bb   : > { %2413 = vmatpush1.bf16.msra.mxu1 %v4054_v10  ;;  %vm2486_vm9 = vmpackc.low %vm1799_vm7, %vm1797_vm6  ;;  %v4088_v10 = vpack.c.bf16 %v4086_v62, %v4087_v48 }
 0x2bc   : > { %2415 = vmatprep.subr.bf16.mxu1 %v4055_v47  ;;  %v4090_v47 = vpack.c.bf16 %v3631_v60, %v3627_v40  ;;  %v1356_v40 = vld [vmem:[%s3944_s5 + $0x20] sm:$0xff] }
 0x2bf   : > { %2417 = vmatpush1.bf16.msra.mxu1 %v4056_v32  ;;  %v1953_v32 = vld [vmem:[%s3945_s6] sm:$0xff] (!%p2211_p9) }
 0x2c0   : > { %2419 = vmatprep.subr.bf16.mxu1 %v4058_v55  ;;  %v1954_v55 = vld [vmem:[%s3945_s6 + $0x8] sm:$0xff] (!%p2211_p9) }
 0x2c1   : > { %2477 = vmatpush1.bf16.xpose.msk.msra.mxu0 %vm2476_vm11, %v2611_v31  ;;  %vm1798_vm11 = vcmp.eq.s32.totalorder %v1760_v8, %v3720_v3 }
 0x2c2   : > { %2479 = vmatprep.subr.msk.bf16.mxu0 %vm2478_vm12, %v2611_v31  ;;  %vm1801_vm12 = vcmp.eq.s32.totalorder %v1761_v5, %v3722_v38  ;;  %vm2488_vm14 = vmpackc.low %vm1798_vm11, %vm1796_vm10  ;;  %v1360_v38 = vld [vmem:[%s3944_s5 + $0x40] sm:$0xff] }
 0x2c3   : > { %2421 = vmatpush1.bf16.msra.mxu1 %v4061_v6  ;;  %vm2490_vm15 = vmpackc.low %vm1803_vm13, %vm1801_vm12 }
 0x2c4   : > { %2423 = vmatprep.subr.bf16.mxu1 %v4063_v1 }
 0x2c7   : > { %2425 = vmatpush1.bf16.msra.mxu1 %v4064_v36 }
 0x2c8   : > { %2427 = vmatprep.subr.bf16.mxu1 %v4065_v39 }
 0x2c9   : > { %2481 = vmatpush1.bf16.xpose.msk.msra.mxu0 %vm2480_vm2, %v2611_v31  ;;  %vm1802_vm2 = vcmp.eq.s32.totalorder %v1762_v17, %v3720_v3  ;;  %v4091_v3 = vmov 0.0  }
 0x2ca   : > { %2483 = vmatprep.subr.msk.bf16.mxu0 %vm2482_vm3, %v2611_v31  ;;  %vm2492_vm3 = vmpackc.low %vm1802_vm2, %vm1800_vm1 }
 0x2cb   : > { %2429 = vmatpush1.bf16.msra.mxu1 %v4068_v16 }
 0x2cc   : > { %2431 = vmatprep.subr.bf16.mxu1 %v4071_v35 }
 0x2cf   : > { %2433 = vmatpush1.bf16.msra.mxu1 %v4072_v41 }
 0x2d0   : > { %2435 = vmatprep.subr.bf16.mxu1 %v4073_v33 }
 0x2d1   : > { %2485 = vmatpush1.bf16.xpose.msk.msra.mxu0 %vm2484_vm8, %v2611_v31 }
 0x2d2   : > { %2487 = vmatprep.subr.msk.bf16.mxu0 %vm2486_vm9, %v2611_v31 }
 0x2d3   : > { %2437 = vmatpush1.bf16.msra.mxu1 %v4075_v0 }
 0x2d4   : > { %2439 = vmatprep.subr.bf16.mxu1 %v4078_v13 }
 0x2d7   : > { %2441 = vmatpush1.bf16.msra.mxu1 %v4079_v58 }
 0x2d8   : > { %2443 = vmatprep.subr.bf16.mxu1 %v4082_v52 }
 0x2d9   : > { %2489 = vmatpush1.bf16.xpose.msk.msra.mxu0 %vm2488_vm14, %v2611_v31 }
 0x2da   : > { %2491 = vmatprep.subr.msk.bf16.mxu0 %vm2490_vm15, %v2611_v31 }
 0x2db   : > { %2445 = vmatpush1.bf16.msra.mxu1 %v4085_v49 }
 0x2dc   : > { %2447 = vmatprep.subr.bf16.mxu1 %v4088_v10 }
 0x2de   : > { %1657 = vmatmul.mubr.f32.vlgmr.msra.gmra.mrb[18].mxu1 %v1354_v25 }
 0x2df   : > { %2449 = vmatpush1.bf16.msra.mxu1 %v4089_v46  ;;  %1662 = vmatprep.mubr.f32.mxu1 %v1360_v38 }
 0x2e0   : > { %2451 = vmatprep.subr.bf16.mxu1 %v2450_v28 }
 0x2e1   : > { %2493 = vmatpush1.bf16.xpose.msk.msra.mxu0 %vm2492_vm3, %v2611_v31 }
 0x2e2   : > { %1663 = vmatmul.mubr.f32.gmra.mrb[20].mxu1 %v1359_v45 }
 0x2e3   : > { %2453 = vmatpush1.bf16.msra.mxu1 %v4090_v47  ;;  %1733 = vmatprep.mubr.f32.mxu1 %v4091_v3 }
 0x2e4   : > { %2455 = vmatprep.subr.bf16.mxu1 %v4092_v9 }
 0x2e7   : > { %2457 = vmatpush1.bf16.msra.mxu1 %v4093_v61 }
 0x2e8   : > { %2459 = vmatprep.subr.bf16.mxu1 %v4094_v11 }
 0x2eb   : > { %2461 = vmatpush1.bf16.msra.mxu1 %v2460_v42 }
 0x2ec   : > { %1685 = vmatprep.subr.mxu1 %v3691_v19 }
 0x2ef   : > { %1686 = vmatpush1.msra.mxu1 %v3695_v21 }
 0x2f0   : > { %2145 = vmatmul.mubr.msk.f32.vlgmr.msra.gmra.mrb[18].mxu1 %vm1508_vm4, %v1356_v40 }
 0x2f1   : > { %1739 = vmatprep.mubr.f32.mxu1 %v4091_v3 }
 0x2f4   : > { %2146 = vmatmul.mubr.msk.f32.gmra.mrb[20].mxu1 %vm1508_vm4, %v1361_v26 }
 0x3c3   : > { %v1735_v44 = vpop.f32.mrb[18].mxu1 }
 0x3c4   : > { %v1737_v60 = vpop.f32.mrb[19].mxu1 }
 0x3c5   : > { %1934 = vmatprep.mubr.f32.mxu0 %v1737_v60 }
 0x3c6   : > { %1935 = vmatmul.mubr.f32.vlgmr.msra.gmra.mrb[22].mxu0 %v1735_v44 }
 0x3c7   : > { %v1741_v37 = vpop.f32.mrb[20].mxu1 }
 0x3c8   : > { %v1743_v15 = vpop.f32.mrb[21].mxu1 }
 0x3c9   : > { %1939 = vmatprep.mubr.f32.mxu0 %v1743_v15 }
 0x3ca   : > { %1940 = vmatmul.mubr.f32.gmra.mrb[24].mxu0 %v1741_v37 }
 0x3cb   : > { %2279 = vmatprep.mubr.msk.f32.mxu0 (!%p2211_p9), %vm629_vm0, %v1953_v32 }
 0x499   : > { %v1936_v50 = vpop.f32.mrb[22].mxu0 }
 0x49a   : > { %v1945_v28 = vadd.f32 %v1936_v50, %v1868_v12  ;;  %v1938_v18 = vpop.f32.mrb[23].mxu0  ;;  %1952 = sbr.rel (%p2211_p9) target bundleno = 1412 (0x584), region = 56 }
 0x49c   : > { %1947 = vst [vmem:[%s2699_s22] sm:$0xff] %v1945_v28 }
 0x49d   : > { %v1941_v22 = vpop.f32.mrb[24].mxu0 }
 0x49e   : > { %v1946_v19 = vadd.f32 %v1941_v22, %v1869_v20  ;;  %v1943_v21 = vpop.f32.mrb[25].mxu0 }
 0x4a0   : > { %1948 = vst [vmem:[%s2699_s22 + $0x8] sm:$0xff] %v1946_v19 }
 0x4a3   : > { %v1955_v42 = vld [vmem:[%s2699_s22] sm:$0xff] }
 0x4a7   : > { %v1956_v31 = vld [vmem:[%s2699_s22 + $0x8] sm:$0xff] }
 0x4a8   : > { %v2494_v14 = vpack.c.bf16 %v1956_v31, %v1955_v42 }
 0x4aa   : > { %2495 = vmatprep.subr.bf16.mxu0 %v2494_v14 }
 0x4ab   : > { %2497 = vmatpush3.bf16.msra.mxu0 %v2494_v14 }
 0x4ae   : > { %2280 = vmatmul.mubr.msk.f32.vlgmr.msra.gmra.mrb[0].mxu0 %vm629_vm0, %v1954_v55 }
 0x581   : > { %v2281_v63 = vpop.f32.mrb[0].mxu0 }
 0x582   : > { %2039 = vst [vmem:[%s2699_s22 + $0x8] sm:$0xff] %v2281_v63  ;;  %v2029_v57 = vpop.f32.mrb[1].mxu0 }
 0x583   : > { %2038 = vst [vmem:[%s2699_s22] sm:$0xff] %v2029_v57 }
 0x584 PF: > { %s17_s28 = sadd.s32 1, %s2606_s28   ;;  %s4095_s24 = smov %s2598_s26 }
 0x585   : > { %p14_p10 = scmp.ge.s32.totalorder %s17_s28, 6   ;;  %s4096_s25 = smov %s2602_s27 }
 0x586   : > { %s4097_s26 = smov %s4100_s29  ;;  %s4098_s27 = smov %s4104_s30 }
 0x587   :  { %16 = sbr.rel (!%p14_p10) target bundleno = 3 (0x3), region = 89 }

</bundles_post_ra>
